<compile_context>
chip_gen: v5e
topology: v5e:2x2
jax: 0.10.0
libtpu: 0.0.40
codegen_flags: <defaults>
</compile_context>

<pallas_src>
import math

import numpy as np
import jax
import jax.numpy as jnp
from jax.experimental import pallas as pl
from jax.experimental.pallas import tpu as pltpu

NEG_SLOPE = 0.01           # nn.LeakyReLU default
LN_EPS = 1e-5              # nn.LayerNorm default
K1 = 3 * 7 * 7             # conv1 im2col contraction dim (147)
K1P = 152                  # padded to a multiple of 8 (was 256: 74% zeros)
M2 = 24                    # layer-2 halo margin (needs >= 17)
M3 = 16                    # layer-3 halo margin (needs >= 9)
TAPS = [(di, dj) for di in (-1, 0, 1) for dj in (-1, 0, 1)]


# ----------------------------- in-kernel helpers ---------------------------

def _lrelu(x):
    # max(x, a*x) == LeakyReLU for 0 < a < 1; one VPU op cheaper than a select.
    return jnp.maximum(x, NEG_SLOPE * x)


def _layernorm(x, gamma, beta, n_elem):
    # LayerNorm over all elements of one sample (biased variance, f32 stats).
    s = jnp.sum(jnp.sum(x, axis=1, keepdims=True), axis=0, keepdims=True)
    mean = s / n_elem
    d = x - mean
    v = jnp.sum(jnp.sum(d * d, axis=1, keepdims=True), axis=0, keepdims=True)
    inv = jax.lax.rsqrt(v / n_elem + LN_EPS)
    return d * inv * gamma + beta


def _pool4(x, q):
    # x: [C, 4*q] in pool-window-major column order -> MaxPool2d(2,2).
    return jnp.maximum(jnp.maximum(x[:, 0:q], x[:, q:2 * q]),
                       jnp.maximum(x[:, 2 * q:3 * q], x[:, 3 * q:4 * q]))


def _conv3x3(x, w_packed, width, margin):
    # x: [Cin, width*width] row-major.  The 9 shifted/masked taps are stacked
    # along sublanes -> ONE MXU matmul at K = 9*Cin (instead of 9 K=Cin dots).
    cin, hw = x.shape
    zeros = jnp.zeros((cin, margin), x.dtype)
    xp = jnp.concatenate([zeros, x, zeros], axis=1)          # zero halo
    col = jax.lax.broadcasted_iota(jnp.int32, (cin, hw), 1) % width
    taps = []
    for di, dj in TAPS:
        s = di * width + dj
        t = xp[:, margin + s: margin + s + hw]
        if dj == -1:
            t = jnp.where(col >= 1, t, 0.0)
        elif dj == 1:
            t = jnp.where(col <= width - 2, t, 0.0)
        taps.append(t)
    stacked = jnp.concatenate(taps, axis=0)                  # [9*Cin, hw]
    return jnp.dot(w_packed, stacked, preferred_element_type=jnp.float32)


# ------------------------------- fused kernel ------------------------------

def fused_forward_kernel(
        p1_ref, w1_ref, b1_ref, gb1_ref,
        w2_ref, b2_ref, gb2_ref, pp2_ref,
        w3_ref, b3_ref, gb3_ref, pp3_ref,
        wh1_ref, bh1_ref, wh2_ref, bh2_ref,
        out_ref):
    f32 = jnp.float32

    # ---- layer 1: conv 7x7 s2 (one bf16 MXU matmul on the im2col block),
    #      LN([8,32,32]) + LeakyReLU + MaxPool(2,2).  Columns are
    #      pool-window-major so the pool is a max of 4 contiguous slices.
    y1 = (jnp.dot(w1_ref[...], p1_ref[...], preferred_element_type=f32)
          + b1_ref[...])                                     # [8, 1024] f32
    gb1 = gb1_ref[...]
    a = _lrelu(_layernorm(y1, gb1[0:8], gb1[8:16], 8.0 * 1024.0))
    a1 = _pool4(a, 256)                                      # [8,256] 16x16 row-major

    # ---- layer 2: conv 8->8 3x3 p1 + LN + LeakyReLU + pool ----------------
    y2 = _conv3x3(a1, w2_ref[...], 16, M2) + b2_ref[...]     # [8, 256]
    gb2 = gb2_ref[...]
    a = _lrelu(_layernorm(y2, gb2[0:8], gb2[8:16], 8.0 * 256.0))
    a = jnp.dot(a, pp2_ref[...], preferred_element_type=f32)  # -> window-major
    a2 = _pool4(a, 64)                                       # [8,64] 8x8 row-major

    # ---- layer 3: conv 8->4 3x3 p1 + LN + LeakyReLU + pool ----------------
    y3 = _conv3x3(a2, w3_ref[...], 8, M3) + b3_ref[...]      # [4, 64]
    gb3 = gb3_ref[...]
    a = _lrelu(_layernorm(y3, gb3[0:4], gb3[4:8], 4.0 * 64.0))
    a = jnp.dot(a, pp3_ref[...], preferred_element_type=f32)
    a3 = _pool4(a, 16)                                       # [4,16] 4x4 row-major

    # ---- head: Flatten + Linear(64,16) + LeakyReLU + Linear(16,10) --------
    # TODO(synk): with multi-sample grid blocks the head could be batched into
    # one [Nb,64]@[64,16] matmul; with one sample per step it stays 4 tiny dots.
    wh1 = wh1_ref[...]
    h = bh1_ref[...]                                         # [1, 16]
    for c in range(4):
        h = h + jnp.dot(a3[c:c + 1, :], wh1[c], preferred_element_type=f32)
    h = _lrelu(h)
    logits = (jnp.dot(h, wh2_ref[...], preferred_element_type=f32)
              + bh2_ref[...])                                # [1, 128] (padded)
    out_ref[0] = jnp.broadcast_to(logits, (8, 128))          # lane-dense store


# --------------------------- host-side preparation -------------------------

def _pool_perm(h, w):
    # Permutation matrix: row-major (h,w) columns -> pool-window-major columns.
    hw = h * w
    perm = np.zeros((hw, hw), np.float32)
    for ph in range(h // 2):
        for pw in range(w // 2):
            for a in range(2):
                for b in range(2):
                    src = (2 * ph + a) * w + (2 * pw + b)
                    dst = (a * 2 + b) * (hw // 4) + ph * (w // 2) + pw
                    perm[src, dst] = 1.0
    return jnp.asarray(perm)


def _window_major(g):
    # [C, H, W] -> [C, H*W] with columns ordered (wy, wx, ph, pw).
    c, h, w = g.shape
    g = g.reshape(c, h // 2, 2, w // 2, 2)
    g = jnp.transpose(g, (0, 2, 4, 1, 3))
    return g.reshape(c, h * w)


def _pack3x3(w):
    # [O, I, 3, 3] -> [O, 9*I] with column k*I + cin, k = kh*3 + kw (TAPS order).
    o, i = w.shape[0], w.shape[1]
    return jnp.transpose(w, (0, 2, 3, 1)).reshape(o, 9 * i)


def prepare_params(p):
    """One-off weight / layout preparation (runs outside jit)."""
    w1m = jnp.pad(p["w1"].reshape(8, K1), ((0, 0), (0, K1P - K1)))
    gb1 = jnp.concatenate([_window_major(p["g1"]), _window_major(p["beta1"])], 0)
    gb2 = jnp.concatenate([p["g2"].reshape(8, 256), p["beta2"].reshape(8, 256)], 0)
    gb3 = jnp.concatenate([p["g3"].reshape(4, 64), p["beta3"].reshape(4, 64)], 0)
    wh2p = jnp.pad(p["wh2"], ((0, 0), (0, 128 - 10)))             # [16, 128]
    bh2p = jnp.pad(p["bh2"].reshape(1, 10), ((0, 0), (0, 128 - 10)))
    return (
        w1m.astype(jnp.bfloat16),        # conv1 weights (bf16 MXU operand)
        p["b1"].reshape(8, 1),
        gb1,                             # [16, 1024] gamma/beta, window-major
        _pack3x3(p["w2"]),               # [8, 72]
        p["b2"].reshape(8, 1),
        gb2,                             # [16, 256]
        _pool_perm(16, 16),              # [256, 256]
        _pack3x3(p["w3"]),               # [4, 72]
        p["b3"].reshape(4, 1),
        gb3,                             # [8, 64]
        _pool_perm(8, 8),                # [64, 64]
        p["wh1"].reshape(4, 16, 16),
        p["bh1"].reshape(1, 16),
        wh2p,                            # [16, 128]
        bh2p,                            # [1, 128]
    )


def _conv1_patches(x):
    # x: [N, 3, 64, 64] -> bf16 [K1P, N*1024]; column order
    #   n*1024 + (oh%2)*512 + (ow%2)*256 + (oh//2)*16 + (ow//2)   (window-major)
    n = x.shape[0]
    xp = jnp.pad(x, ((0, 0), (0, 0), (3, 3), (3, 3)))
    cols = [xp[:, :, i:i + 64:2, j:j + 64:2]
            for i in range(7) for j in range(7)]                 # [N,3,32,32] each
    pt = jnp.stack(cols, axis=0).reshape(7, 7, n, 3, 16, 2, 16, 2)
    pt = jnp.transpose(pt, (3, 0, 1, 2, 5, 7, 4, 6))             # [C,kh,kw,N,a,b,ph,pw]
    pt = pt.reshape(K1, n * 1024)
    pt = jnp.pad(pt, ((0, K1P - K1), (0, 0)))
    return pt.astype(jnp.bfloat16)


def forward(prep, x):
    n = x.shape[0]
    patches = _conv1_patches(x)                                  # [K1P, n*1024] bf16

    def const_spec(shape):
        nd = len(shape)
        return pl.BlockSpec(shape, lambda i, _nd=nd: (0,) * _nd)

    in_specs = [pl.BlockSpec((K1P, 1024), lambda i: (0, i))]     # per-sample block
    in_specs += [const_spec(a.shape) for a in prep]              # constants: 1 fetch

    out = pl.pallas_call(
        fused_forward_kernel,
        out_shape=jax.ShapeDtypeStruct((n, 8, 128), jnp.float32),
        grid=(n,),
        in_specs=in_specs,
        out_specs=pl.BlockSpec((1, 8, 128), lambda i: (i, 0, 0)),
        compiler_params=pltpu.CompilerParams(
            dimension_semantics=("parallel",)),
    )(patches, *prep)
    return out[:, 0, :10]


# --------------------------------- params ----------------------------------

def _uniform(key, shape, bound):
    return jax.random.uniform(key, shape, jnp.float32, -bound, bound)


def init_params(key):
    ks = jax.random.split(key, 16)
    p = {}
    fan = 3 * 7 * 7
    p["w1"] = _uniform(ks[0], (8, 3, 7, 7), 1 / math.sqrt(fan))
    p["b1"] = _uniform(ks[1], (8,), 1 / math.sqrt(fan))
    p["g1"] = 1.0 + 0.02 * jax.random.normal(ks[2], (8, 32, 32), jnp.float32)
    p["beta1"] = 0.02 * jax.random.normal(ks[3], (8, 32, 32), jnp.float32)
    fan = 8 * 3 * 3
    p["w2"] = _uniform(ks[4], (8, 8, 3, 3), 1 / math.sqrt(fan))
    p["b2"] = _uniform(ks[5], (8,), 1 / math.sqrt(fan))
    p["g2"] = 1.0 + 0.02 * jax.random.normal(ks[6], (8, 16, 16), jnp.float32)
    p["beta2"] = 0.02 * jax.random.normal(ks[7], (8, 16, 16), jnp.float32)
    p["w3"] = _uniform(ks[8], (4, 8, 3, 3), 1 / math.sqrt(fan))
    p["b3"] = _uniform(ks[9], (4,), 1 / math.sqrt(fan))
    p["g3"] = 1.0 + 0.02 * jax.random.normal(ks[10], (4, 8, 8), jnp.float32)
    p["beta3"] = 0.02 * jax.random.normal(ks[11], (4, 8, 8), jnp.float32)
    p["wh1"] = _uniform(ks[12], (64, 16), 1 / math.sqrt(64))     # [in, out]
    p["bh1"] = _uniform(ks[13], (16,), 1 / math.sqrt(64))
    p["wh2"] = _uniform(ks[14], (16, 10), 1 / math.sqrt(16))     # [in, out]
    p["bh2"] = _uniform(ks[15], (10,), 1 / math.sqrt(16))
    return p


if __name__ == "__main__":
    # LayerNorm([8,32,32]) after Conv(k7,s2,p3) implies a 64x64 spatial input.
    x = jax.random.normal(jax.random.PRNGKey(0), (2, 3, 64, 64), jnp.float32)
    params = init_params(jax.random.PRNGKey(42))
    prep = prepare_params(params)          # one-off layout prep, outside jit
    fwd = jax.jit(forward)
    out = jax.block_until_ready(fwd(prep, x))
    assert out.shape == (2, 10), out.shape
    assert bool(jnp.all(jnp.isfinite(out)))
    print("KERNEL_OK")
</pallas_src>

<mosaic_0001>
module attributes {stable_mosaic.version = 11 : i64} {
  func.func @fused_forward_kernel(%arg0: i32, %arg1: memref<152x1024xbf16, #tpu.memory_space<vmem>>, %arg2: memref<8x152xbf16, #tpu.memory_space<vmem>>, %arg3: memref<8x1xf32, #tpu.memory_space<vmem>>, %arg4: memref<16x1024xf32, #tpu.memory_space<vmem>>, %arg5: memref<8x72xf32, #tpu.memory_space<vmem>>, %arg6: memref<8x1xf32, #tpu.memory_space<vmem>>, %arg7: memref<16x256xf32, #tpu.memory_space<vmem>>, %arg8: memref<256x256xf32, #tpu.memory_space<vmem>>, %arg9: memref<4x72xf32, #tpu.memory_space<vmem>>, %arg10: memref<4x1xf32, #tpu.memory_space<vmem>>, %arg11: memref<8x64xf32, #tpu.memory_space<vmem>>, %arg12: memref<64x64xf32, #tpu.memory_space<vmem>>, %arg13: memref<4x16x16xf32, #tpu.memory_space<vmem>>, %arg14: memref<1x16xf32, #tpu.memory_space<vmem>>, %arg15: memref<16x128xf32, #tpu.memory_space<vmem>>, %arg16: memref<1x128xf32, #tpu.memory_space<vmem>>, %arg17: memref<1x8x128xf32, #tpu.memory_space<vmem>>) attributes {dimension_semantics = [#tpu.dimension_semantics<parallel>], iteration_bounds = array<i64: 2>, scalar_prefetch = 0 : i64, scratch_operands = 0 : i64, tpu.core_type = #tpu.core_type<tc>, window_params = [{transform_indices = @transform_0, window_bounds = array<i64: 152, 1024>}, {pipeline_mode = #tpu.pipeline_mode<synchronous>, transform_indices = @transform_1, window_bounds = array<i64: 8, 152>}, {pipeline_mode = #tpu.pipeline_mode<synchronous>, transform_indices = @transform_2, window_bounds = array<i64: 8, 1>}, {pipeline_mode = #tpu.pipeline_mode<synchronous>, transform_indices = @transform_3, window_bounds = array<i64: 16, 1024>}, {pipeline_mode = #tpu.pipeline_mode<synchronous>, transform_indices = @transform_4, window_bounds = array<i64: 8, 72>}, {pipeline_mode = #tpu.pipeline_mode<synchronous>, transform_indices = @transform_5, window_bounds = array<i64: 8, 1>}, {pipeline_mode = #tpu.pipeline_mode<synchronous>, transform_indices = @transform_6, window_bounds = array<i64: 16, 256>}, {pipeline_mode = #tpu.pipeline_mode<synchronous>, transform_indices = @transform_7, window_bounds = array<i64: 256, 256>}, {pipeline_mode = #tpu.pipeline_mode<synchronous>, transform_indices = @transform_8, window_bounds = array<i64: 4, 72>}, {pipeline_mode = #tpu.pipeline_mode<synchronous>, transform_indices = @transform_9, window_bounds = array<i64: 4, 1>}, {pipeline_mode = #tpu.pipeline_mode<synchronous>, transform_indices = @transform_10, window_bounds = array<i64: 8, 64>}, {pipeline_mode = #tpu.pipeline_mode<synchronous>, transform_indices = @transform_11, window_bounds = array<i64: 64, 64>}, {pipeline_mode = #tpu.pipeline_mode<synchronous>, transform_indices = @transform_12, window_bounds = array<i64: 4, 16, 16>}, {pipeline_mode = #tpu.pipeline_mode<synchronous>, transform_indices = @transform_13, window_bounds = array<i64: 1, 16>}, {pipeline_mode = #tpu.pipeline_mode<synchronous>, transform_indices = @transform_14, window_bounds = array<i64: 16, 128>}, {pipeline_mode = #tpu.pipeline_mode<synchronous>, transform_indices = @transform_15, window_bounds = array<i64: 1, 128>}, {transform_indices = @transform_16, window_bounds = array<i64: 1, 8, 128>}]} {
    %c0 = arith.constant 0 : index
    %c0_0 = arith.constant 0 : index
    %0 = vector.load %arg2[%c0, %c0_0] : memref<8x152xbf16, #tpu.memory_space<vmem>>, vector<8x152xbf16>
    %c0_1 = arith.constant 0 : index
    %c0_2 = arith.constant 0 : index
    %1 = vector.load %arg1[%c0_1, %c0_2] : memref<152x1024xbf16, #tpu.memory_space<vmem>>, vector<152x1024xbf16>
    %cst = arith.constant dense<0.000000e+00> : vector<8x1024xf32>
    %2 = tpu.matmul %0, %1, %cst {dimension_numbers = #tpu.dot_dimension_numbers<[1], [0], [0], [1], [0, 0, 1, 1], [], []>} : vector<8x152xbf16>, vector<152x1024xbf16>, vector<8x1024xf32> -> vector<8x1024xf32>
    %c0_3 = arith.constant 0 : index
    %c0_4 = arith.constant 0 : index
    %3 = vector.load %arg3[%c0_3, %c0_4] : memref<8x1xf32, #tpu.memory_space<vmem>>, vector<8x1xf32>
    %4 = vector.broadcast %3 : vector<8x1xf32> to vector<8x1024xf32>
    %5 = arith.addf %2, %4 : vector<8x1024xf32>
    %c0_5 = arith.constant 0 : index
    %c0_6 = arith.constant 0 : index
    %6 = vector.load %arg4[%c0_5, %c0_6] : memref<16x1024xf32, #tpu.memory_space<vmem>>, vector<16x1024xf32>
    %7 = vector.extract_strided_slice %6 {offsets = [0, 0], sizes = [8, 1024], strides = [1, 1]} : vector<16x1024xf32> to vector<8x1024xf32>
    %8 = vector.extract_strided_slice %6 {offsets = [8, 0], sizes = [8, 1024], strides = [1, 1]} : vector<16x1024xf32> to vector<8x1024xf32>
    %cst_7 = arith.constant dense<0.000000e+00> : vector<8xf32>
    %9 = vector.multi_reduction <add>, %5, %cst_7 [1] : vector<8x1024xf32> to vector<8xf32>
    %10 = vector.shape_cast %9 : vector<8xf32> to vector<8x1xf32>
    %cst_8 = arith.constant dense<0.000000e+00> : vector<1xf32>
    %11 = vector.multi_reduction <add>, %10, %cst_8 [0] : vector<8x1xf32> to vector<1xf32>
    %12 = vector.shape_cast %11 : vector<1xf32> to vector<1x1xf32>
    %cst_9 = arith.constant 8.192000e+03 : f32
    %13 = vector.broadcast %cst_9 : f32 to vector<1x1xf32>
    %14 = arith.divf %12, %13 : vector<1x1xf32>
    %15 = vector.broadcast %14 : vector<1x1xf32> to vector<8x1024xf32>
    %16 = arith.subf %5, %15 : vector<8x1024xf32>
    %17 = arith.mulf %16, %16 : vector<8x1024xf32>
    %cst_10 = arith.constant dense<0.000000e+00> : vector<8xf32>
    %18 = vector.multi_reduction <add>, %17, %cst_10 [1] : vector<8x1024xf32> to vector<8xf32>
    %19 = vector.shape_cast %18 : vector<8xf32> to vector<8x1xf32>
    %cst_11 = arith.constant dense<0.000000e+00> : vector<1xf32>
    %20 = vector.multi_reduction <add>, %19, %cst_11 [0] : vector<8x1xf32> to vector<1xf32>
    %21 = vector.shape_cast %20 : vector<1xf32> to vector<1x1xf32>
    %cst_12 = arith.constant 8.192000e+03 : f32
    %22 = vector.broadcast %cst_12 : f32 to vector<1x1xf32>
    %23 = arith.divf %21, %22 : vector<1x1xf32>
    %cst_13 = arith.constant 9.99999974E-6 : f32
    %24 = vector.broadcast %cst_13 : f32 to vector<1x1xf32>
    %25 = arith.addf %23, %24 : vector<1x1xf32>
    %26 = math.rsqrt %25 : vector<1x1xf32>
    %27 = vector.broadcast %26 : vector<1x1xf32> to vector<8x1024xf32>
    %28 = arith.mulf %16, %27 : vector<8x1024xf32>
    %29 = arith.mulf %28, %7 : vector<8x1024xf32>
    %30 = arith.addf %29, %8 : vector<8x1024xf32>
    %cst_14 = arith.constant 0.00999999977 : f32
    %31 = vector.broadcast %cst_14 : f32 to vector<8x1024xf32>
    %32 = arith.mulf %31, %30 : vector<8x1024xf32>
    %33 = arith.maximumf %30, %32 : vector<8x1024xf32>
    %34 = vector.extract_strided_slice %33 {offsets = [0, 0], sizes = [8, 256], strides = [1, 1]} : vector<8x1024xf32> to vector<8x256xf32>
    %35 = vector.extract_strided_slice %33 {offsets = [0, 256], sizes = [8, 256], strides = [1, 1]} : vector<8x1024xf32> to vector<8x256xf32>
    %36 = arith.maximumf %34, %35 : vector<8x256xf32>
    %37 = vector.extract_strided_slice %33 {offsets = [0, 512], sizes = [8, 256], strides = [1, 1]} : vector<8x1024xf32> to vector<8x256xf32>
    %38 = vector.extract_strided_slice %33 {offsets = [0, 768], sizes = [8, 256], strides = [1, 1]} : vector<8x1024xf32> to vector<8x256xf32>
    %39 = arith.maximumf %37, %38 : vector<8x256xf32>
    %40 = arith.maximumf %36, %39 : vector<8x256xf32>
    %c0_15 = arith.constant 0 : index
    %c0_16 = arith.constant 0 : index
    %41 = vector.load %arg5[%c0_15, %c0_16] : memref<8x72xf32, #tpu.memory_space<vmem>>, vector<8x72xf32>
    %cst_17 = arith.constant 0.000000e+00 : f32
    %42 = vector.broadcast %cst_17 : f32 to vector<8x24xf32>
    %43 = tpu.concatenate %42, %40, %42 in 1 : vector<8x24xf32>, vector<8x256xf32>, vector<8x24xf32> -> vector<8x304xf32>
    %44 = tpu.iota {dimensions = array<i32: 1>} : vector<8x256xi32>
    %c16_i32 = arith.constant 16 : i32
    %c0_i32 = arith.constant 0 : i32
    %45 = arith.cmpi eq, %c16_i32, %c0_i32 : i32
    %c1_i32 = arith.constant 1 : i32
    %46 = arith.select %45, %c1_i32, %c16_i32 : i32
    %47 = vector.broadcast %46 : i32 to vector<8x256xi32>
    %48 = arith.remsi %44, %47 : vector<8x256xi32>
    %c0_i32_18 = arith.constant 0 : i32
    %49 = vector.broadcast %c0_i32_18 : i32 to vector<8x256xi32>
    %50 = arith.cmpi ne, %48, %49 : vector<8x256xi32>
    %c0_i32_19 = arith.constant 0 : i32
    %51 = vector.broadcast %c0_i32_19 : i32 to vector<8x256xi32>
    %52 = arith.cmpi slt, %48, %51 : vector<8x256xi32>
    %c0_i32_20 = arith.constant 0 : i32
    %53 = arith.cmpi slt, %46, %c0_i32_20 : i32
    %54 = vector.broadcast %53 : i1 to vector<8x256xi1>
    %55 = vector.broadcast %54 : vector<8x256xi1> to vector<8x256xi1>
    %56 = arith.xori %52, %55 : vector<8x256xi1>
    %57 = arith.andi %56, %50 : vector<8x256xi1>
    %58 = vector.broadcast %46 : i32 to vector<8x256xi32>
    %59 = arith.addi %48, %58 : vector<8x256xi32>
    %60 = arith.select %57, %59, %48 : vector<8x256xi1>, vector<8x256xi32>
    %61 = vector.extract_strided_slice %43 {offsets = [0, 7], sizes = [8, 256], strides = [1, 1]} : vector<8x304xf32> to vector<8x256xf32>
    %c1_i32_21 = arith.constant 1 : i32
    %62 = vector.broadcast %c1_i32_21 : i32 to vector<8x256xi32>
    %63 = arith.cmpi sge, %60, %62 : vector<8x256xi32>
    %cst_22 = arith.constant 0.000000e+00 : f32
    %64 = vector.broadcast %cst_22 : f32 to vector<8x256xf32>
    %65 = arith.select %63, %61, %64 : vector<8x256xi1>, vector<8x256xf32>
    %66 = vector.extract_strided_slice %43 {offsets = [0, 8], sizes = [8, 256], strides = [1, 1]} : vector<8x304xf32> to vector<8x256xf32>
    %67 = vector.extract_strided_slice %43 {offsets = [0, 9], sizes = [8, 256], strides = [1, 1]} : vector<8x304xf32> to vector<8x256xf32>
    %c14_i32 = arith.constant 14 : i32
    %68 = vector.broadcast %c14_i32 : i32 to vector<8x256xi32>
    %69 = arith.cmpi sle, %60, %68 : vector<8x256xi32>
    %cst_23 = arith.constant 0.000000e+00 : f32
    %70 = vector.broadcast %cst_23 : f32 to vector<8x256xf32>
    %71 = arith.select %69, %67, %70 : vector<8x256xi1>, vector<8x256xf32>
    %72 = vector.extract_strided_slice %43 {offsets = [0, 23], sizes = [8, 256], strides = [1, 1]} : vector<8x304xf32> to vector<8x256xf32>
    %c1_i32_24 = arith.constant 1 : i32
    %73 = vector.broadcast %c1_i32_24 : i32 to vector<8x256xi32>
    %74 = arith.cmpi sge, %60, %73 : vector<8x256xi32>
    %cst_25 = arith.constant 0.000000e+00 : f32
    %75 = vector.broadcast %cst_25 : f32 to vector<8x256xf32>
    %76 = arith.select %74, %72, %75 : vector<8x256xi1>, vector<8x256xf32>
    %77 = vector.extract_strided_slice %43 {offsets = [0, 24], sizes = [8, 256], strides = [1, 1]} : vector<8x304xf32> to vector<8x256xf32>
    %78 = vector.extract_strided_slice %43 {offsets = [0, 25], sizes = [8, 256], strides = [1, 1]} : vector<8x304xf32> to vector<8x256xf32>
    %c14_i32_26 = arith.constant 14 : i32
    %79 = vector.broadcast %c14_i32_26 : i32 to vector<8x256xi32>
    %80 = arith.cmpi sle, %60, %79 : vector<8x256xi32>
    %cst_27 = arith.constant 0.000000e+00 : f32
    %81 = vector.broadcast %cst_27 : f32 to vector<8x256xf32>
    %82 = arith.select %80, %78, %81 : vector<8x256xi1>, vector<8x256xf32>
    %83 = vector.extract_strided_slice %43 {offsets = [0, 39], sizes = [8, 256], strides = [1, 1]} : vector<8x304xf32> to vector<8x256xf32>
    %c1_i32_28 = arith.constant 1 : i32
    %84 = vector.broadcast %c1_i32_28 : i32 to vector<8x256xi32>
    %85 = arith.cmpi sge, %60, %84 : vector<8x256xi32>
    %cst_29 = arith.constant 0.000000e+00 : f32
    %86 = vector.broadcast %cst_29 : f32 to vector<8x256xf32>
    %87 = arith.select %85, %83, %86 : vector<8x256xi1>, vector<8x256xf32>
    %88 = vector.extract_strided_slice %43 {offsets = [0, 40], sizes = [8, 256], strides = [1, 1]} : vector<8x304xf32> to vector<8x256xf32>
    %89 = vector.extract_strided_slice %43 {offsets = [0, 41], sizes = [8, 256], strides = [1, 1]} : vector<8x304xf32> to vector<8x256xf32>
    %c14_i32_30 = arith.constant 14 : i32
    %90 = vector.broadcast %c14_i32_30 : i32 to vector<8x256xi32>
    %91 = arith.cmpi sle, %60, %90 : vector<8x256xi32>
    %cst_31 = arith.constant 0.000000e+00 : f32
    %92 = vector.broadcast %cst_31 : f32 to vector<8x256xf32>
    %93 = arith.select %91, %89, %92 : vector<8x256xi1>, vector<8x256xf32>
    %94 = tpu.concatenate %65, %66, %71, %76, %77, %82, %87, %88, %93 in 0 : vector<8x256xf32>, vector<8x256xf32>, vector<8x256xf32>, vector<8x256xf32>, vector<8x256xf32>, vector<8x256xf32>, vector<8x256xf32>, vector<8x256xf32>, vector<8x256xf32> -> vector<72x256xf32>
    %cst_32 = arith.constant dense<0.000000e+00> : vector<8x256xf32>
    %95 = tpu.matmul %41, %94, %cst_32 {dimension_numbers = #tpu.dot_dimension_numbers<[1], [0], [0], [1], [0, 0, 1, 1], [], []>} : vector<8x72xf32>, vector<72x256xf32>, vector<8x256xf32> -> vector<8x256xf32>
    %c0_33 = arith.constant 0 : index
    %c0_34 = arith.constant 0 : index
    %96 = vector.load %arg6[%c0_33, %c0_34] : memref<8x1xf32, #tpu.memory_space<vmem>>, vector<8x1xf32>
    %97 = vector.broadcast %96 : vector<8x1xf32> to vector<8x256xf32>
    %98 = arith.addf %95, %97 : vector<8x256xf32>
    %c0_35 = arith.constant 0 : index
    %c0_36 = arith.constant 0 : index
    %99 = vector.load %arg7[%c0_35, %c0_36] : memref<16x256xf32, #tpu.memory_space<vmem>>, vector<16x256xf32>
    %100 = vector.extract_strided_slice %99 {offsets = [0, 0], sizes = [8, 256], strides = [1, 1]} : vector<16x256xf32> to vector<8x256xf32>
    %101 = vector.extract_strided_slice %99 {offsets = [8, 0], sizes = [8, 256], strides = [1, 1]} : vector<16x256xf32> to vector<8x256xf32>
    %cst_37 = arith.constant dense<0.000000e+00> : vector<8xf32>
    %102 = vector.multi_reduction <add>, %98, %cst_37 [1] : vector<8x256xf32> to vector<8xf32>
    %103 = vector.shape_cast %102 : vector<8xf32> to vector<8x1xf32>
    %cst_38 = arith.constant dense<0.000000e+00> : vector<1xf32>
    %104 = vector.multi_reduction <add>, %103, %cst_38 [0] : vector<8x1xf32> to vector<1xf32>
    %105 = vector.shape_cast %104 : vector<1xf32> to vector<1x1xf32>
    %cst_39 = arith.constant 2.048000e+03 : f32
    %106 = vector.broadcast %cst_39 : f32 to vector<1x1xf32>
    %107 = arith.divf %105, %106 : vector<1x1xf32>
    %108 = vector.broadcast %107 : vector<1x1xf32> to vector<8x256xf32>
    %109 = arith.subf %98, %108 : vector<8x256xf32>
    %110 = arith.mulf %109, %109 : vector<8x256xf32>
    %cst_40 = arith.constant dense<0.000000e+00> : vector<8xf32>
    %111 = vector.multi_reduction <add>, %110, %cst_40 [1] : vector<8x256xf32> to vector<8xf32>
    %112 = vector.shape_cast %111 : vector<8xf32> to vector<8x1xf32>
    %cst_41 = arith.constant dense<0.000000e+00> : vector<1xf32>
    %113 = vector.multi_reduction <add>, %112, %cst_41 [0] : vector<8x1xf32> to vector<1xf32>
    %114 = vector.shape_cast %113 : vector<1xf32> to vector<1x1xf32>
    %cst_42 = arith.constant 2.048000e+03 : f32
    %115 = vector.broadcast %cst_42 : f32 to vector<1x1xf32>
    %116 = arith.divf %114, %115 : vector<1x1xf32>
    %cst_43 = arith.constant 9.99999974E-6 : f32
    %117 = vector.broadcast %cst_43 : f32 to vector<1x1xf32>
    %118 = arith.addf %116, %117 : vector<1x1xf32>
    %119 = math.rsqrt %118 : vector<1x1xf32>
    %120 = vector.broadcast %119 : vector<1x1xf32> to vector<8x256xf32>
    %121 = arith.mulf %109, %120 : vector<8x256xf32>
    %122 = arith.mulf %121, %100 : vector<8x256xf32>
    %123 = arith.addf %122, %101 : vector<8x256xf32>
    %cst_44 = arith.constant 0.00999999977 : f32
    %124 = vector.broadcast %cst_44 : f32 to vector<8x256xf32>
    %125 = arith.mulf %124, %123 : vector<8x256xf32>
    %126 = arith.maximumf %123, %125 : vector<8x256xf32>
    %c0_45 = arith.constant 0 : index
    %c0_46 = arith.constant 0 : index
    %127 = vector.load %arg8[%c0_45, %c0_46] : memref<256x256xf32, #tpu.memory_space<vmem>>, vector<256x256xf32>
    %cst_47 = arith.constant dense<0.000000e+00> : vector<8x256xf32>
    %128 = tpu.matmul %126, %127, %cst_47 {dimension_numbers = #tpu.dot_dimension_numbers<[1], [0], [0], [1], [0, 0, 1, 1], [], []>} : vector<8x256xf32>, vector<256x256xf32>, vector<8x256xf32> -> vector<8x256xf32>
    %129 = vector.extract_strided_slice %128 {offsets = [0, 0], sizes = [8, 64], strides = [1, 1]} : vector<8x256xf32> to vector<8x64xf32>
    %130 = vector.extract_strided_slice %128 {offsets = [0, 64], sizes = [8, 64], strides = [1, 1]} : vector<8x256xf32> to vector<8x64xf32>
    %131 = arith.maximumf %129, %130 : vector<8x64xf32>
    %132 = vector.extract_strided_slice %128 {offsets = [0, 128], sizes = [8, 64], strides = [1, 1]} : vector<8x256xf32> to vector<8x64xf32>
    %133 = vector.extract_strided_slice %128 {offsets = [0, 192], sizes = [8, 64], strides = [1, 1]} : vector<8x256xf32> to vector<8x64xf32>
    %134 = arith.maximumf %132, %133 : vector<8x64xf32>
    %135 = arith.maximumf %131, %134 : vector<8x64xf32>
    %c0_48 = arith.constant 0 : index
    %c0_49 = arith.constant 0 : index
    %136 = vector.load %arg9[%c0_48, %c0_49] : memref<4x72xf32, #tpu.memory_space<vmem>>, vector<4x72xf32>
    %cst_50 = arith.constant 0.000000e+00 : f32
    %137 = vector.broadcast %cst_50 : f32 to vector<8x16xf32>
    %138 = tpu.concatenate %137, %135, %137 in 1 : vector<8x16xf32>, vector<8x64xf32>, vector<8x16xf32> -> vector<8x96xf32>
    %139 = tpu.iota {dimensions = array<i32: 1>} : vector<8x64xi32>
    %c8_i32 = arith.constant 8 : i32
    %c0_i32_51 = arith.constant 0 : i32
    %140 = arith.cmpi eq, %c8_i32, %c0_i32_51 : i32
    %c1_i32_52 = arith.constant 1 : i32
    %141 = arith.select %140, %c1_i32_52, %c8_i32 : i32
    %142 = vector.broadcast %141 : i32 to vector<8x64xi32>
    %143 = arith.remsi %139, %142 : vector<8x64xi32>
    %c0_i32_53 = arith.constant 0 : i32
    %144 = vector.broadcast %c0_i32_53 : i32 to vector<8x64xi32>
    %145 = arith.cmpi ne, %143, %144 : vector<8x64xi32>
    %c0_i32_54 = arith.constant 0 : i32
    %146 = vector.broadcast %c0_i32_54 : i32 to vector<8x64xi32>
    %147 = arith.cmpi slt, %143, %146 : vector<8x64xi32>
    %c0_i32_55 = arith.constant 0 : i32
    %148 = arith.cmpi slt, %141, %c0_i32_55 : i32
    %149 = vector.broadcast %148 : i1 to vector<8x64xi1>
    %150 = vector.broadcast %149 : vector<8x64xi1> to vector<8x64xi1>
    %151 = arith.xori %147, %150 : vector<8x64xi1>
    %152 = arith.andi %151, %145 : vector<8x64xi1>
    %153 = vector.broadcast %141 : i32 to vector<8x64xi32>
    %154 = arith.addi %143, %153 : vector<8x64xi32>
    %155 = arith.select %152, %154, %143 : vector<8x64xi1>, vector<8x64xi32>
    %156 = vector.extract_strided_slice %138 {offsets = [0, 7], sizes = [8, 64], strides = [1, 1]} : vector<8x96xf32> to vector<8x64xf32>
    %c1_i32_56 = arith.constant 1 : i32
    %157 = vector.broadcast %c1_i32_56 : i32 to vector<8x64xi32>
    %158 = arith.cmpi sge, %155, %157 : vector<8x64xi32>
    %cst_57 = arith.constant 0.000000e+00 : f32
    %159 = vector.broadcast %cst_57 : f32 to vector<8x64xf32>
    %160 = arith.select %158, %156, %159 : vector<8x64xi1>, vector<8x64xf32>
    %161 = vector.extract_strided_slice %138 {offsets = [0, 8], sizes = [8, 64], strides = [1, 1]} : vector<8x96xf32> to vector<8x64xf32>
    %162 = vector.extract_strided_slice %138 {offsets = [0, 9], sizes = [8, 64], strides = [1, 1]} : vector<8x96xf32> to vector<8x64xf32>
    %c6_i32 = arith.constant 6 : i32
    %163 = vector.broadcast %c6_i32 : i32 to vector<8x64xi32>
    %164 = arith.cmpi sle, %155, %163 : vector<8x64xi32>
    %cst_58 = arith.constant 0.000000e+00 : f32
    %165 = vector.broadcast %cst_58 : f32 to vector<8x64xf32>
    %166 = arith.select %164, %162, %165 : vector<8x64xi1>, vector<8x64xf32>
    %167 = vector.extract_strided_slice %138 {offsets = [0, 15], sizes = [8, 64], strides = [1, 1]} : vector<8x96xf32> to vector<8x64xf32>
    %c1_i32_59 = arith.constant 1 : i32
    %168 = vector.broadcast %c1_i32_59 : i32 to vector<8x64xi32>
    %169 = arith.cmpi sge, %155, %168 : vector<8x64xi32>
    %cst_60 = arith.constant 0.000000e+00 : f32
    %170 = vector.broadcast %cst_60 : f32 to vector<8x64xf32>
    %171 = arith.select %169, %167, %170 : vector<8x64xi1>, vector<8x64xf32>
    %172 = vector.extract_strided_slice %138 {offsets = [0, 16], sizes = [8, 64], strides = [1, 1]} : vector<8x96xf32> to vector<8x64xf32>
    %173 = vector.extract_strided_slice %138 {offsets = [0, 17], sizes = [8, 64], strides = [1, 1]} : vector<8x96xf32> to vector<8x64xf32>
    %c6_i32_61 = arith.constant 6 : i32
    %174 = vector.broadcast %c6_i32_61 : i32 to vector<8x64xi32>
    %175 = arith.cmpi sle, %155, %174 : vector<8x64xi32>
    %cst_62 = arith.constant 0.000000e+00 : f32
    %176 = vector.broadcast %cst_62 : f32 to vector<8x64xf32>
    %177 = arith.select %175, %173, %176 : vector<8x64xi1>, vector<8x64xf32>
    %178 = vector.extract_strided_slice %138 {offsets = [0, 23], sizes = [8, 64], strides = [1, 1]} : vector<8x96xf32> to vector<8x64xf32>
    %c1_i32_63 = arith.constant 1 : i32
    %179 = vector.broadcast %c1_i32_63 : i32 to vector<8x64xi32>
    %180 = arith.cmpi sge, %155, %179 : vector<8x64xi32>
    %cst_64 = arith.constant 0.000000e+00 : f32
    %181 = vector.broadcast %cst_64 : f32 to vector<8x64xf32>
    %182 = arith.select %180, %178, %181 : vector<8x64xi1>, vector<8x64xf32>
    %183 = vector.extract_strided_slice %138 {offsets = [0, 24], sizes = [8, 64], strides = [1, 1]} : vector<8x96xf32> to vector<8x64xf32>
    %184 = vector.extract_strided_slice %138 {offsets = [0, 25], sizes = [8, 64], strides = [1, 1]} : vector<8x96xf32> to vector<8x64xf32>
    %c6_i32_65 = arith.constant 6 : i32
    %185 = vector.broadcast %c6_i32_65 : i32 to vector<8x64xi32>
    %186 = arith.cmpi sle, %155, %185 : vector<8x64xi32>
    %cst_66 = arith.constant 0.000000e+00 : f32
    %187 = vector.broadcast %cst_66 : f32 to vector<8x64xf32>
    %188 = arith.select %186, %184, %187 : vector<8x64xi1>, vector<8x64xf32>
    %189 = tpu.concatenate %160, %161, %166, %171, %172, %177, %182, %183, %188 in 0 : vector<8x64xf32>, vector<8x64xf32>, vector<8x64xf32>, vector<8x64xf32>, vector<8x64xf32>, vector<8x64xf32>, vector<8x64xf32>, vector<8x64xf32>, vector<8x64xf32> -> vector<72x64xf32>
    %cst_67 = arith.constant dense<0.000000e+00> : vector<4x64xf32>
    %190 = tpu.matmul %136, %189, %cst_67 {dimension_numbers = #tpu.dot_dimension_numbers<[1], [0], [0], [1], [0, 0, 1, 1], [], []>} : vector<4x72xf32>, vector<72x64xf32>, vector<4x64xf32> -> vector<4x64xf32>
    %c0_68 = arith.constant 0 : index
    %c0_69 = arith.constant 0 : index
    %191 = vector.load %arg10[%c0_68, %c0_69] : memref<4x1xf32, #tpu.memory_space<vmem>>, vector<4x1xf32>
    %192 = vector.broadcast %191 : vector<4x1xf32> to vector<4x64xf32>
    %193 = arith.addf %190, %192 : vector<4x64xf32>
    %c0_70 = arith.constant 0 : index
    %c0_71 = arith.constant 0 : index
    %194 = vector.load %arg11[%c0_70, %c0_71] : memref<8x64xf32, #tpu.memory_space<vmem>>, vector<8x64xf32>
    %195 = vector.extract_strided_slice %194 {offsets = [0, 0], sizes = [4, 64], strides = [1, 1]} : vector<8x64xf32> to vector<4x64xf32>
    %196 = vector.extract_strided_slice %194 {offsets = [4, 0], sizes = [4, 64], strides = [1, 1]} : vector<8x64xf32> to vector<4x64xf32>
    %cst_72 = arith.constant dense<0.000000e+00> : vector<4xf32>
    %197 = vector.multi_reduction <add>, %193, %cst_72 [1] : vector<4x64xf32> to vector<4xf32>
    %198 = vector.shape_cast %197 : vector<4xf32> to vector<4x1xf32>
    %cst_73 = arith.constant dense<0.000000e+00> : vector<1xf32>
    %199 = vector.multi_reduction <add>, %198, %cst_73 [0] : vector<4x1xf32> to vector<1xf32>
    %200 = vector.shape_cast %199 : vector<1xf32> to vector<1x1xf32>
    %cst_74 = arith.constant 2.560000e+02 : f32
    %201 = vector.broadcast %cst_74 : f32 to vector<1x1xf32>
    %202 = arith.divf %200, %201 : vector<1x1xf32>
    %203 = vector.broadcast %202 : vector<1x1xf32> to vector<4x64xf32>
    %204 = arith.subf %193, %203 : vector<4x64xf32>
    %205 = arith.mulf %204, %204 : vector<4x64xf32>
    %cst_75 = arith.constant dense<0.000000e+00> : vector<4xf32>
    %206 = vector.multi_reduction <add>, %205, %cst_75 [1] : vector<4x64xf32> to vector<4xf32>
    %207 = vector.shape_cast %206 : vector<4xf32> to vector<4x1xf32>
    %cst_76 = arith.constant dense<0.000000e+00> : vector<1xf32>
    %208 = vector.multi_reduction <add>, %207, %cst_76 [0] : vector<4x1xf32> to vector<1xf32>
    %209 = vector.shape_cast %208 : vector<1xf32> to vector<1x1xf32>
    %cst_77 = arith.constant 2.560000e+02 : f32
    %210 = vector.broadcast %cst_77 : f32 to vector<1x1xf32>
    %211 = arith.divf %209, %210 : vector<1x1xf32>
    %cst_78 = arith.constant 9.99999974E-6 : f32
    %212 = vector.broadcast %cst_78 : f32 to vector<1x1xf32>
    %213 = arith.addf %211, %212 : vector<1x1xf32>
    %214 = math.rsqrt %213 : vector<1x1xf32>
    %215 = vector.broadcast %214 : vector<1x1xf32> to vector<4x64xf32>
    %216 = arith.mulf %204, %215 : vector<4x64xf32>
    %217 = arith.mulf %216, %195 : vector<4x64xf32>
    %218 = arith.addf %217, %196 : vector<4x64xf32>
    %cst_79 = arith.constant 0.00999999977 : f32
    %219 = vector.broadcast %cst_79 : f32 to vector<4x64xf32>
    %220 = arith.mulf %219, %218 : vector<4x64xf32>
    %221 = arith.maximumf %218, %220 : vector<4x64xf32>
    %c0_80 = arith.constant 0 : index
    %c0_81 = arith.constant 0 : index
    %222 = vector.load %arg12[%c0_80, %c0_81] : memref<64x64xf32, #tpu.memory_space<vmem>>, vector<64x64xf32>
    %cst_82 = arith.constant dense<0.000000e+00> : vector<4x64xf32>
    %223 = tpu.matmul %221, %222, %cst_82 {dimension_numbers = #tpu.dot_dimension_numbers<[1], [0], [0], [1], [0, 0, 1, 1], [], []>} : vector<4x64xf32>, vector<64x64xf32>, vector<4x64xf32> -> vector<4x64xf32>
    %224 = vector.extract_strided_slice %223 {offsets = [0, 0], sizes = [4, 16], strides = [1, 1]} : vector<4x64xf32> to vector<4x16xf32>
    %225 = vector.extract_strided_slice %223 {offsets = [0, 16], sizes = [4, 16], strides = [1, 1]} : vector<4x64xf32> to vector<4x16xf32>
    %226 = arith.maximumf %224, %225 : vector<4x16xf32>
    %227 = vector.extract_strided_slice %223 {offsets = [0, 32], sizes = [4, 16], strides = [1, 1]} : vector<4x64xf32> to vector<4x16xf32>
    %228 = vector.extract_strided_slice %223 {offsets = [0, 48], sizes = [4, 16], strides = [1, 1]} : vector<4x64xf32> to vector<4x16xf32>
    %229 = arith.maximumf %227, %228 : vector<4x16xf32>
    %230 = arith.maximumf %226, %229 : vector<4x16xf32>
    %c0_83 = arith.constant 0 : index
    %c0_84 = arith.constant 0 : index
    %c0_85 = arith.constant 0 : index
    %231 = vector.load %arg13[%c0_83, %c0_84, %c0_85] : memref<4x16x16xf32, #tpu.memory_space<vmem>>, vector<4x16x16xf32>
    %c0_86 = arith.constant 0 : index
    %c0_87 = arith.constant 0 : index
    %232 = vector.load %arg14[%c0_86, %c0_87] : memref<1x16xf32, #tpu.memory_space<vmem>>, vector<1x16xf32>
    %233 = vector.extract_strided_slice %230 {offsets = [0, 0], sizes = [1, 16], strides = [1, 1]} : vector<4x16xf32> to vector<1x16xf32>
    %234 = vector.extract_strided_slice %231 {offsets = [0, 0, 0], sizes = [1, 16, 16], strides = [1, 1, 1]} : vector<4x16x16xf32> to vector<1x16x16xf32>
    %235 = vector.shape_cast %234 : vector<1x16x16xf32> to vector<16x16xf32>
    %cst_88 = arith.constant dense<0.000000e+00> : vector<1x16xf32>
    %236 = tpu.matmul %233, %235, %cst_88 {dimension_numbers = #tpu.dot_dimension_numbers<[1], [0], [0], [1], [0, 0, 1, 1], [], []>} : vector<1x16xf32>, vector<16x16xf32>, vector<1x16xf32> -> vector<1x16xf32>
    %237 = arith.addf %232, %236 : vector<1x16xf32>
    %238 = vector.extract_strided_slice %230 {offsets = [1, 0], sizes = [1, 16], strides = [1, 1]} : vector<4x16xf32> to vector<1x16xf32>
    %239 = vector.extract_strided_slice %231 {offsets = [1, 0, 0], sizes = [1, 16, 16], strides = [1, 1, 1]} : vector<4x16x16xf32> to vector<1x16x16xf32>
    %240 = vector.shape_cast %239 : vector<1x16x16xf32> to vector<16x16xf32>
    %cst_89 = arith.constant dense<0.000000e+00> : vector<1x16xf32>
    %241 = tpu.matmul %238, %240, %cst_89 {dimension_numbers = #tpu.dot_dimension_numbers<[1], [0], [0], [1], [0, 0, 1, 1], [], []>} : vector<1x16xf32>, vector<16x16xf32>, vector<1x16xf32> -> vector<1x16xf32>
    %242 = arith.addf %237, %241 : vector<1x16xf32>
    %243 = vector.extract_strided_slice %230 {offsets = [2, 0], sizes = [1, 16], strides = [1, 1]} : vector<4x16xf32> to vector<1x16xf32>
    %244 = vector.extract_strided_slice %231 {offsets = [2, 0, 0], sizes = [1, 16, 16], strides = [1, 1, 1]} : vector<4x16x16xf32> to vector<1x16x16xf32>
    %245 = vector.shape_cast %244 : vector<1x16x16xf32> to vector<16x16xf32>
    %cst_90 = arith.constant dense<0.000000e+00> : vector<1x16xf32>
    %246 = tpu.matmul %243, %245, %cst_90 {dimension_numbers = #tpu.dot_dimension_numbers<[1], [0], [0], [1], [0, 0, 1, 1], [], []>} : vector<1x16xf32>, vector<16x16xf32>, vector<1x16xf32> -> vector<1x16xf32>
    %247 = arith.addf %242, %246 : vector<1x16xf32>
    %248 = vector.extract_strided_slice %230 {offsets = [3, 0], sizes = [1, 16], strides = [1, 1]} : vector<4x16xf32> to vector<1x16xf32>
    %249 = vector.extract_strided_slice %231 {offsets = [3, 0, 0], sizes = [1, 16, 16], strides = [1, 1, 1]} : vector<4x16x16xf32> to vector<1x16x16xf32>
    %250 = vector.shape_cast %249 : vector<1x16x16xf32> to vector<16x16xf32>
    %cst_91 = arith.constant dense<0.000000e+00> : vector<1x16xf32>
    %251 = tpu.matmul %248, %250, %cst_91 {dimension_numbers = #tpu.dot_dimension_numbers<[1], [0], [0], [1], [0, 0, 1, 1], [], []>} : vector<1x16xf32>, vector<16x16xf32>, vector<1x16xf32> -> vector<1x16xf32>
    %252 = arith.addf %247, %251 : vector<1x16xf32>
    %cst_92 = arith.constant 0.00999999977 : f32
    %253 = vector.broadcast %cst_92 : f32 to vector<1x16xf32>
    %254 = arith.mulf %253, %252 : vector<1x16xf32>
    %255 = arith.maximumf %252, %254 : vector<1x16xf32>
    %c0_93 = arith.constant 0 : index
    %c0_94 = arith.constant 0 : index
    %256 = vector.load %arg15[%c0_93, %c0_94] : memref<16x128xf32, #tpu.memory_space<vmem>>, vector<16x128xf32>
    %cst_95 = arith.constant dense<0.000000e+00> : vector<1x128xf32>
    %257 = tpu.matmul %255, %256, %cst_95 {dimension_numbers = #tpu.dot_dimension_numbers<[1], [0], [0], [1], [0, 0, 1, 1], [], []>} : vector<1x16xf32>, vector<16x128xf32>, vector<1x128xf32> -> vector<1x128xf32>
    %c0_96 = arith.constant 0 : index
    %c0_97 = arith.constant 0 : index
    %258 = vector.load %arg16[%c0_96, %c0_97] : memref<1x128xf32, #tpu.memory_space<vmem>>, vector<1x128xf32>
    %259 = arith.addf %257, %258 : vector<1x128xf32>
    %260 = vector.shape_cast %259 : vector<1x128xf32> to vector<1x128xf32>
    %261 = vector.broadcast %260 : vector<1x128xf32> to vector<8x128xf32>
    %c0_98 = arith.constant 0 : index
    %c0_99 = arith.constant 0 : index
    %c0_100 = arith.constant 0 : index
    %262 = vector.load %arg17[%c0_98, %c0_99, %c0_100] : memref<1x8x128xf32, #tpu.memory_space<vmem>>, vector<1x8x128xf32>
    %263 = vector.shape_cast %262 : vector<1x8x128xf32> to vector<8x128xf32>
    %264 = vector.shape_cast %261 : vector<8x128xf32> to vector<1x8x128xf32>
    tpu.vector_store %arg17[%c0_98, %c0_99, %c0_100], %264 {strides = array<i32>} : memref<1x8x128xf32, #tpu.memory_space<vmem>>, vector<1x8x128xf32>,
    return
  }
  func.func @transform_0(%arg0: i32) -> (i32, i32) {
    %c0_i32 = arith.constant 0 : i32
    %c0_i32_0 = arith.constant 0 : i32
    return %c0_i32, %arg0 : i32, i32
  }
  func.func @transform_1(%arg0: i32) -> (i32, i32) {
    %c0_i32 = arith.constant 0 : i32
    %c0_i32_0 = arith.constant 0 : i32
    %c0_i32_1 = arith.constant 0 : i32
    return %c0_i32, %c0_i32_0 : i32, i32
  }
  func.func @transform_2(%arg0: i32) -> (i32, i32) {
    %c0_i32 = arith.constant 0 : i32
    %c0_i32_0 = arith.constant 0 : i32
    %c0_i32_1 = arith.constant 0 : i32
    return %c0_i32, %c0_i32_0 : i32, i32
  }
  func.func @transform_3(%arg0: i32) -> (i32, i32) {
    %c0_i32 = arith.constant 0 : i32
    %c0_i32_0 = arith.constant 0 : i32
    %c0_i32_1 = arith.constant 0 : i32
    return %c0_i32, %c0_i32_0 : i32, i32
  }
  func.func @transform_4(%arg0: i32) -> (i32, i32) {
    %c0_i32 = arith.constant 0 : i32
    %c0_i32_0 = arith.constant 0 : i32
    %c0_i32_1 = arith.constant 0 : i32
    return %c0_i32, %c0_i32_0 : i32, i32
  }
  func.func @transform_5(%arg0: i32) -> (i32, i32) {
    %c0_i32 = arith.constant 0 : i32
    %c0_i32_0 = arith.constant 0 : i32
    %c0_i32_1 = arith.constant 0 : i32
    return %c0_i32, %c0_i32_0 : i32, i32
  }
  func.func @transform_6(%arg0: i32) -> (i32, i32) {
    %c0_i32 = arith.constant 0 : i32
    %c0_i32_0 = arith.constant 0 : i32
    %c0_i32_1 = arith.constant 0 : i32
    return %c0_i32, %c0_i32_0 : i32, i32
  }
  func.func @transform_7(%arg0: i32) -> (i32, i32) {
    %c0_i32 = arith.constant 0 : i32
    %c0_i32_0 = arith.constant 0 : i32
    %c0_i32_1 = arith.constant 0 : i32
    return %c0_i32, %c0_i32_0 : i32, i32
  }
  func.func @transform_8(%arg0: i32) -> (i32, i32) {
    %c0_i32 = arith.constant 0 : i32
    %c0_i32_0 = arith.constant 0 : i32
    %c0_i32_1 = arith.constant 0 : i32
    return %c0_i32, %c0_i32_0 : i32, i32
  }
  func.func @transform_9(%arg0: i32) -> (i32, i32) {
    %c0_i32 = arith.constant 0 : i32
    %c0_i32_0 = arith.constant 0 : i32
    %c0_i32_1 = arith.constant 0 : i32
    return %c0_i32, %c0_i32_0 : i32, i32
  }
  func.func @transform_10(%arg0: i32) -> (i32, i32) {
    %c0_i32 = arith.constant 0 : i32
    %c0_i32_0 = arith.constant 0 : i32
    %c0_i32_1 = arith.constant 0 : i32
    return %c0_i32, %c0_i32_0 : i32, i32
  }
  func.func @transform_11(%arg0: i32) -> (i32, i32) {
    %c0_i32 = arith.constant 0 : i32
    %c0_i32_0 = arith.constant 0 : i32
    %c0_i32_1 = arith.constant 0 : i32
    return %c0_i32, %c0_i32_0 : i32, i32
  }
  func.func @transform_12(%arg0: i32) -> (i32, i32, i32) {
    %c0_i32 = arith.constant 0 : i32
    %c0_i32_0 = arith.constant 0 : i32
    %c0_i32_1 = arith.constant 0 : i32
    %c0_i32_2 = arith.constant 0 : i32
    return %c0_i32, %c0_i32_0, %c0_i32_1 : i32, i32, i32
  }
  func.func @transform_13(%arg0: i32) -> (i32, i32) {
    %c0_i32 = arith.constant 0 : i32
    %c0_i32_0 = arith.constant 0 : i32
    %c0_i32_1 = arith.constant 0 : i32
    return %c0_i32, %c0_i32_0 : i32, i32
  }
  func.func @transform_14(%arg0: i32) -> (i32, i32) {
    %c0_i32 = arith.constant 0 : i32
    %c0_i32_0 = arith.constant 0 : i32
    %c0_i32_1 = arith.constant 0 : i32
    return %c0_i32, %c0_i32_0 : i32, i32
  }
  func.func @transform_15(%arg0: i32) -> (i32, i32) {
    %c0_i32 = arith.constant 0 : i32
    %c0_i32_0 = arith.constant 0 : i32
    %c0_i32_1 = arith.constant 0 : i32
    return %c0_i32, %c0_i32_0 : i32, i32
  }
  func.func @transform_16(%arg0: i32) -> (i32, i32, i32) {
    %c0_i32 = arith.constant 0 : i32
    %c0_i32_0 = arith.constant 0 : i32
    %c0_i32_1 = arith.constant 0 : i32
    return %arg0, %c0_i32, %c0_i32_0 : i32, i32, i32
  }
}

</mosaic_0001>

<bundles_post_ra>
// kernel: forward.1
= control target key start
LH: loop header
LB: loop body
LE: loop exit
PB: predicated region body
PF: predicated region fallthrough
CT: control target
= control target key end

     0   :  { %s3775_s0 = inlined_call_operand.vmem [shape: bf16[152,2048], index: 0, kind: input, shape index: {}]   ;;  %s3776_s1 = inlined_call_operand.vmem [shape: bf16[8,152], index: 1, kind: input, shape index: {}]   ;;  %s3777_s2 = inlined_call_operand.vmem [shape: f32[8,1], index: 2, kind: input, shape index: {}]   ;;  %s3778_s3 = inlined_call_operand.vmem [shape: f32[16,1024], index: 3, kind: input, shape index: {}]   ;;  %s3779_s4 = inlined_call_operand.vmem [shape: f32[8,72], index: 4, kind: input, shape index: {}]   ;;  %s3780_s5 = inlined_call_operand.vmem [shape: f32[8,1], index: 5, kind: input, shape index: {}]   ;;  %s3781_s6 = inlined_call_operand.vmem [shape: f32[16,256], index: 6, kind: input, shape index: {}]   ;;  %s3782_s7 = inlined_call_operand.vmem [shape: f32[256,256], index: 7, kind: input, shape index: {}]   ;;  %s3783_s8 = inlined_call_operand.vmem [shape: f32[4,72], index: 8, kind: input, shape index: {}]   ;;  %s3784_s9 = inlined_call_operand.vmem [shape: f32[4,1], index: 9, kind: input, shape index: {}]   ;;  %s3785_s10 = inlined_call_operand.vmem [shape: f32[8,64], index: 10, kind: input, shape index: {}]   ;;  %s3786_s11 = inlined_call_operand.vmem [shape: f32[64,64], index: 11, kind: input, shape index: {}]   ;;  %s3787_s12 = inlined_call_operand.vmem [shape: f32[4,16,16], index: 12, kind: input, shape index: {}]   ;;  %s3788_s13 = inlined_call_operand.vmem [shape: f32[1,16], index: 13, kind: input, shape index: {}]   ;;  %s3789_s14 = inlined_call_operand.vmem [shape: f32[16,128], index: 14, kind: input, shape index: {}]   ;;  %s3790_s15 = inlined_call_operand.vmem [shape: f32[1,128], index: 15, kind: input, shape index: {}]   ;;  %s3791_s16 = inlined_call_operand.vmem [shape: f32[2,8,128], index: 16, kind: output, shape index: {}]  }
   0x1   :  { %3796 = sst [smem:[#allocation3_spill]] %s3775_s0 }
   0x2   :  { %3797 = sst [smem:[#allocation4_spill]] %s3776_s1 }
   0x3   :  { %s2927_s21 = smov 0   ;;  %s2929_s22 = smov 0  }
   0x4   :  { %s2931_s23 = smov 0  }
   0x5 LB: > { %s2944_s25 = sadd.s32 1, %s2820_s23   ;;  %s33_s27 = sadd.s32 1, %s2816_s22  ;;  %s2820_s23 = sphi %s2931_s23, %s3816_s23   ;;  %s2816_s22 = sphi %s2929_s22, %s3815_s22   ;;  %s2812_s21 = sphi %s2927_s21, %s3814_s21  }
   0x6   : > { %s30_s26 = ssub.s32 %s2820_s23, %s2944_s25  ;;  %p40_p1 = scmp.ne.s32.totalorder %s2816_s22, %s2812_s21 }
   0x7   : > { %p31_p0 = scmp.eq.s32.totalorder %s30_s26, 0  ;;  %p41_p2 = scmp.eq.s32.totalorder %s2820_s23, 0 }
   0x8   : > { %p2320_p4 = scmp.ge.s32.totalorder %s2820_s23, 2 }
   0x9   : > { %s2953_s28 = scalar_select %p31_p0, %s2816_s22, %s33_s27  }
   0xa   : > { %p42_p3 = por %p41_p2, %p40_p1  ;;  %452 = sbr.rel (%p2320_p4) target bundleno = 101 (0x65), region = 76 }
   0xf   : > { %455 = sbr.rel (!%p42_p3) target bundleno = 101 (0x65), region = 80  ;;  %s457_s29 = sand.u32 (%p42_p3), 1, %s2816_s22  }
  0x10   : > { %s2650_s30 = sshll.u32 (%p42_p3), %s2820_s23, 5  ;;  %s2723_s0 = smul.u32 (%p42_p3), 608, %s457_s29 }
  0x11   : > { %s3798_s19 = sld [smem:[#allocation3_spill]] (%p42_p3) }
  0x12   : > { %s2966_s26 = scalar_lea.vmem (%p42_p3), [#allocation2], %s2723_s0 }
  0x17   : > { %s2961_s20 = scalar_lea.vmem %s3798_s19, %s2650_s30 }
  0x18   : > { %v475_v0 = vld [vmem:[%s2961_s20] sm:$0xff]  ;;  %v477_v1 = vld [vmem:[%s2961_s20 + $0x8] sm:$0xff]  ;;  %v479_v2 = vld [vmem:[%s2961_s20 + $0x10] sm:$0xff] }
  0x19   : > { %476 = vst [vmem:[%s2966_s26] sm:$0xff] %v475_v0  ;;  %v481_v3 = vld [vmem:[%s2961_s20 + $0x18] sm:$0xff]  ;;  %v483_v4 = vld [vmem:[%s2961_s20 + $0x40] sm:$0xff]  ;;  %v485_v5 = vld [vmem:[%s2961_s20 + $0x48] sm:$0xff] }
  0x1a   : > { %478 = vst [vmem:[%s2966_s26 + $0x8] sm:$0xff] %v477_v1  ;;  %v487_v6 = vld [vmem:[%s2961_s20 + $0x50] sm:$0xff]  ;;  %v489_v7 = vld [vmem:[%s2961_s20 + $0x58] sm:$0xff]  ;;  %v491_v8 = vld [vmem:[%s2961_s20 + $0x80] sm:$0xff] }
  0x1b   : > { %480 = vst [vmem:[%s2966_s26 + $0x10] sm:$0xff] %v479_v2  ;;  %v493_v9 = vld [vmem:[%s2961_s20 + $0x88] sm:$0xff]  ;;  %v495_v10 = vld [vmem:[%s2961_s20 + $0x90] sm:$0xff]  ;;  %v497_v11 = vld [vmem:[%s2961_s20 + $0x98] sm:$0xff] }
  0x1c   : > { %482 = vst [vmem:[%s2966_s26 + $0x18] sm:$0xff] %v481_v3  ;;  %v499_v12 = vld [vmem:[%s2961_s20 + $0xc0] sm:$0xff]  ;;  %v501_v13 = vld [vmem:[%s2961_s20 + $0xc8] sm:$0xff]  ;;  %v503_v14 = vld [vmem:[%s2961_s20 + $0xd0] sm:$0xff] }
  0x1d   : > { %484 = vst [vmem:[%s2966_s26 + $0x20] sm:$0xff] %v483_v4  ;;  %v505_v15 = vld [vmem:[%s2961_s20 + $0xd8] sm:$0xff]  ;;  %v507_v16 = vld [vmem:[%s2961_s20 + $0x100] sm:$0xff]  ;;  %v509_v17 = vld [vmem:[%s2961_s20 + $0x108] sm:$0xff] }
  0x1e   : > { %486 = vst [vmem:[%s2966_s26 + $0x28] sm:$0xff] %v485_v5  ;;  %v511_v18 = vld [vmem:[%s2961_s20 + $0x110] sm:$0xff]  ;;  %v513_v19 = vld [vmem:[%s2961_s20 + $0x118] sm:$0xff]  ;;  %v515_v20 = vld [vmem:[%s2961_s20 + $0x140] sm:$0xff] }
  0x1f   : > { %488 = vst [vmem:[%s2966_s26 + $0x30] sm:$0xff] %v487_v6  ;;  %v517_v21 = vld [vmem:[%s2961_s20 + $0x148] sm:$0xff]  ;;  %v519_v22 = vld [vmem:[%s2961_s20 + $0x150] sm:$0xff]  ;;  %v521_v23 = vld [vmem:[%s2961_s20 + $0x158] sm:$0xff] }
  0x20   : > { %490 = vst [vmem:[%s2966_s26 + $0x38] sm:$0xff] %v489_v7  ;;  %v523_v24 = vld [vmem:[%s2961_s20 + $0x180] sm:$0xff]  ;;  %v525_v25 = vld [vmem:[%s2961_s20 + $0x188] sm:$0xff]  ;;  %v527_v26 = vld [vmem:[%s2961_s20 + $0x190] sm:$0xff] }
  0x21   : > { %492 = vst [vmem:[%s2966_s26 + $0x40] sm:$0xff] %v491_v8  ;;  %v529_v27 = vld [vmem:[%s2961_s20 + $0x198] sm:$0xff]  ;;  %v531_v28 = vld [vmem:[%s2961_s20 + $0x1c0] sm:$0xff]  ;;  %v533_v29 = vld [vmem:[%s2961_s20 + $0x1c8] sm:$0xff] }
  0x22   : > { %494 = vst [vmem:[%s2966_s26 + $0x48] sm:$0xff] %v493_v9  ;;  %v535_v30 = vld [vmem:[%s2961_s20 + $0x1d0] sm:$0xff]  ;;  %v537_v31 = vld [vmem:[%s2961_s20 + $0x1d8] sm:$0xff]  ;;  %v539_v32 = vld [vmem:[%s2961_s20 + $0x200] sm:$0xff] }
  0x23   : > { %496 = vst [vmem:[%s2966_s26 + $0x50] sm:$0xff] %v495_v10  ;;  %v541_v33 = vld [vmem:[%s2961_s20 + $0x208] sm:$0xff]  ;;  %v543_v34 = vld [vmem:[%s2961_s20 + $0x210] sm:$0xff]  ;;  %v545_v35 = vld [vmem:[%s2961_s20 + $0x218] sm:$0xff] }
  0x24   : > { %498 = vst [vmem:[%s2966_s26 + $0x58] sm:$0xff] %v497_v11  ;;  %v547_v36 = vld [vmem:[%s2961_s20 + $0x240] sm:$0xff]  ;;  %v549_v37 = vld [vmem:[%s2961_s20 + $0x248] sm:$0xff]  ;;  %v551_v38 = vld [vmem:[%s2961_s20 + $0x250] sm:$0xff] }
  0x25   : > { %500 = vst [vmem:[%s2966_s26 + $0x60] sm:$0xff] %v499_v12  ;;  %v553_v39 = vld [vmem:[%s2961_s20 + $0x258] sm:$0xff]  ;;  %v555_v40 = vld [vmem:[%s2961_s20 + $0x280] sm:$0xff]  ;;  %v557_v41 = vld [vmem:[%s2961_s20 + $0x288] sm:$0xff] }
  0x26   : > { %502 = vst [vmem:[%s2966_s26 + $0x68] sm:$0xff] %v501_v13  ;;  %v559_v42 = vld [vmem:[%s2961_s20 + $0x290] sm:$0xff]  ;;  %v561_v43 = vld [vmem:[%s2961_s20 + $0x298] sm:$0xff]  ;;  %v563_v44 = vld [vmem:[%s2961_s20 + $0x2c0] sm:$0xff] }
  0x27   : > { %504 = vst [vmem:[%s2966_s26 + $0x70] sm:$0xff] %v503_v14  ;;  %v565_v45 = vld [vmem:[%s2961_s20 + $0x2c8] sm:$0xff]  ;;  %v567_v46 = vld [vmem:[%s2961_s20 + $0x2d0] sm:$0xff]  ;;  %v569_v47 = vld [vmem:[%s2961_s20 + $0x2d8] sm:$0xff] }
  0x28   : > { %506 = vst [vmem:[%s2966_s26 + $0x78] sm:$0xff] %v505_v15  ;;  %v571_v48 = vld [vmem:[%s2961_s20 + $0x300] sm:$0xff]  ;;  %v573_v49 = vld [vmem:[%s2961_s20 + $0x308] sm:$0xff]  ;;  %v575_v50 = vld [vmem:[%s2961_s20 + $0x310] sm:$0xff] }
  0x29   : > { %508 = vst [vmem:[%s2966_s26 + $0x80] sm:$0xff] %v507_v16  ;;  %v577_v51 = vld [vmem:[%s2961_s20 + $0x318] sm:$0xff]  ;;  %v579_v52 = vld [vmem:[%s2961_s20 + $0x340] sm:$0xff]  ;;  %v581_v53 = vld [vmem:[%s2961_s20 + $0x348] sm:$0xff] }
  0x2a   : > { %510 = vst [vmem:[%s2966_s26 + $0x88] sm:$0xff] %v509_v17  ;;  %v583_v54 = vld [vmem:[%s2961_s20 + $0x350] sm:$0xff]  ;;  %v585_v55 = vld [vmem:[%s2961_s20 + $0x358] sm:$0xff]  ;;  %v587_v56 = vld [vmem:[%s2961_s20 + $0x380] sm:$0xff] }
  0x2b   : > { %512 = vst [vmem:[%s2966_s26 + $0x90] sm:$0xff] %v511_v18  ;;  %v589_v57 = vld [vmem:[%s2961_s20 + $0x388] sm:$0xff]  ;;  %v591_v58 = vld [vmem:[%s2961_s20 + $0x390] sm:$0xff]  ;;  %v593_v59 = vld [vmem:[%s2961_s20 + $0x398] sm:$0xff] }
  0x2c   : > { %514 = vst [vmem:[%s2966_s26 + $0x98] sm:$0xff] %v513_v19  ;;  %v595_v60 = vld [vmem:[%s2961_s20 + $0x3c0] sm:$0xff]  ;;  %v597_v61 = vld [vmem:[%s2961_s20 + $0x3c8] sm:$0xff]  ;;  %v599_v62 = vld [vmem:[%s2961_s20 + $0x3d0] sm:$0xff] }
  0x2d   : > { %516 = vst [vmem:[%s2966_s26 + $0xa0] sm:$0xff] %v515_v20  ;;  %v601_v63 = vld [vmem:[%s2961_s20 + $0x3d8] sm:$0xff]  ;;  %v603_v0 = vld [vmem:[%s2961_s20 + $0x400] sm:$0xff]  ;;  %v605_v1 = vld [vmem:[%s2961_s20 + $0x408] sm:$0xff] }
  0x2e   : > { %518 = vst [vmem:[%s2966_s26 + $0xa8] sm:$0xff] %v517_v21  ;;  %v607_v2 = vld [vmem:[%s2961_s20 + $0x410] sm:$0xff]  ;;  %v609_v3 = vld [vmem:[%s2961_s20 + $0x418] sm:$0xff]  ;;  %v611_v4 = vld [vmem:[%s2961_s20 + $0x440] sm:$0xff] }
  0x2f   : > { %520 = vst [vmem:[%s2966_s26 + $0xb0] sm:$0xff] %v519_v22  ;;  %v613_v5 = vld [vmem:[%s2961_s20 + $0x448] sm:$0xff]  ;;  %v615_v6 = vld [vmem:[%s2961_s20 + $0x450] sm:$0xff]  ;;  %v617_v7 = vld [vmem:[%s2961_s20 + $0x458] sm:$0xff] }
  0x30   : > { %522 = vst [vmem:[%s2966_s26 + $0xb8] sm:$0xff] %v521_v23  ;;  %v619_v8 = vld [vmem:[%s2961_s20 + $0x480] sm:$0xff]  ;;  %v621_v9 = vld [vmem:[%s2961_s20 + $0x488] sm:$0xff]  ;;  %v623_v10 = vld [vmem:[%s2961_s20 + $0x490] sm:$0xff] }
  0x31   : > { %524 = vst [vmem:[%s2966_s26 + $0xc0] sm:$0xff] %v523_v24  ;;  %v625_v11 = vld [vmem:[%s2961_s20 + $0x498] sm:$0xff] }
  0x32   : > { %526 = vst [vmem:[%s2966_s26 + $0xc8] sm:$0xff] %v525_v25 }
  0x33   : > { %528 = vst [vmem:[%s2966_s26 + $0xd0] sm:$0xff] %v527_v26 }
  0x34   : > { %530 = vst [vmem:[%s2966_s26 + $0xd8] sm:$0xff] %v529_v27 }
  0x35   : > { %532 = vst [vmem:[%s2966_s26 + $0xe0] sm:$0xff] %v531_v28 }
  0x36   : > { %534 = vst [vmem:[%s2966_s26 + $0xe8] sm:$0xff] %v533_v29 }
  0x37   : > { %536 = vst [vmem:[%s2966_s26 + $0xf0] sm:$0xff] %v535_v30 }
  0x38   : > { %538 = vst [vmem:[%s2966_s26 + $0xf8] sm:$0xff] %v537_v31 }
  0x39   : > { %540 = vst [vmem:[%s2966_s26 + $0x100] sm:$0xff] %v539_v32 }
  0x3a   : > { %542 = vst [vmem:[%s2966_s26 + $0x108] sm:$0xff] %v541_v33 }
  0x3b   : > { %544 = vst [vmem:[%s2966_s26 + $0x110] sm:$0xff] %v543_v34 }
  0x3c   : > { %546 = vst [vmem:[%s2966_s26 + $0x118] sm:$0xff] %v545_v35 }
  0x3d   : > { %548 = vst [vmem:[%s2966_s26 + $0x120] sm:$0xff] %v547_v36 }
  0x3e   : > { %550 = vst [vmem:[%s2966_s26 + $0x128] sm:$0xff] %v549_v37 }
  0x3f   : > { %552 = vst [vmem:[%s2966_s26 + $0x130] sm:$0xff] %v551_v38 }
  0x40   : > { %554 = vst [vmem:[%s2966_s26 + $0x138] sm:$0xff] %v553_v39 }
  0x41   : > { %556 = vst [vmem:[%s2966_s26 + $0x140] sm:$0xff] %v555_v40 }
  0x42   : > { %558 = vst [vmem:[%s2966_s26 + $0x148] sm:$0xff] %v557_v41 }
  0x43   : > { %560 = vst [vmem:[%s2966_s26 + $0x150] sm:$0xff] %v559_v42 }
  0x44   : > { %562 = vst [vmem:[%s2966_s26 + $0x158] sm:$0xff] %v561_v43 }
  0x45   : > { %564 = vst [vmem:[%s2966_s26 + $0x160] sm:$0xff] %v563_v44 }
  0x46   : > { %566 = vst [vmem:[%s2966_s26 + $0x168] sm:$0xff] %v565_v45 }
  0x47   : > { %568 = vst [vmem:[%s2966_s26 + $0x170] sm:$0xff] %v567_v46 }
  0x48   : > { %570 = vst [vmem:[%s2966_s26 + $0x178] sm:$0xff] %v569_v47 }
  0x49   : > { %572 = vst [vmem:[%s2966_s26 + $0x180] sm:$0xff] %v571_v48 }
  0x4a   : > { %574 = vst [vmem:[%s2966_s26 + $0x188] sm:$0xff] %v573_v49 }
  0x4b   : > { %576 = vst [vmem:[%s2966_s26 + $0x190] sm:$0xff] %v575_v50 }
  0x4c   : > { %578 = vst [vmem:[%s2966_s26 + $0x198] sm:$0xff] %v577_v51 }
  0x4d   : > { %580 = vst [vmem:[%s2966_s26 + $0x1a0] sm:$0xff] %v579_v52 }
  0x4e   : > { %582 = vst [vmem:[%s2966_s26 + $0x1a8] sm:$0xff] %v581_v53 }
  0x4f   : > { %584 = vst [vmem:[%s2966_s26 + $0x1b0] sm:$0xff] %v583_v54 }
  0x50   : > { %586 = vst [vmem:[%s2966_s26 + $0x1b8] sm:$0xff] %v585_v55 }
  0x51   : > { %588 = vst [vmem:[%s2966_s26 + $0x1c0] sm:$0xff] %v587_v56 }
  0x52   : > { %590 = vst [vmem:[%s2966_s26 + $0x1c8] sm:$0xff] %v589_v57 }
  0x53   : > { %592 = vst [vmem:[%s2966_s26 + $0x1d0] sm:$0xff] %v591_v58 }
  0x54   : > { %594 = vst [vmem:[%s2966_s26 + $0x1d8] sm:$0xff] %v593_v59 }
  0x55   : > { %596 = vst [vmem:[%s2966_s26 + $0x1e0] sm:$0xff] %v595_v60 }
  0x56   : > { %598 = vst [vmem:[%s2966_s26 + $0x1e8] sm:$0xff] %v597_v61 }
  0x57   : > { %600 = vst [vmem:[%s2966_s26 + $0x1f0] sm:$0xff] %v599_v62 }
  0x58   : > { %602 = vst [vmem:[%s2966_s26 + $0x1f8] sm:$0xff] %v601_v63 }
  0x59   : > { %604 = vst [vmem:[%s2966_s26 + $0x200] sm:$0xff] %v603_v0 }
  0x5a   : > { %606 = vst [vmem:[%s2966_s26 + $0x208] sm:$0xff] %v605_v1 }
  0x5b   : > { %608 = vst [vmem:[%s2966_s26 + $0x210] sm:$0xff] %v607_v2 }
  0x5c   : > { %610 = vst [vmem:[%s2966_s26 + $0x218] sm:$0xff] %v609_v3 }
  0x5d   : > { %612 = vst [vmem:[%s2966_s26 + $0x220] sm:$0xff] %v611_v4 }
  0x5e   : > { %614 = vst [vmem:[%s2966_s26 + $0x228] sm:$0xff] %v613_v5 }
  0x5f   : > { %616 = vst [vmem:[%s2966_s26 + $0x230] sm:$0xff] %v615_v6 }
  0x60   : > { %618 = vst [vmem:[%s2966_s26 + $0x238] sm:$0xff] %v617_v7 }
  0x61   : > { %620 = vst [vmem:[%s2966_s26 + $0x240] sm:$0xff] %v619_v8 }
  0x62   : > { %622 = vst [vmem:[%s2966_s26 + $0x248] sm:$0xff] %v621_v9 }
  0x63   : > { %624 = vst [vmem:[%s2966_s26 + $0x250] sm:$0xff] %v623_v10 }
  0x64   : > { %626 = vst [vmem:[%s2966_s26 + $0x258] sm:$0xff] %v625_v11 }
  0x65 PF: > { %p2323_p5 = scmp.ge.s32.totalorder %s2820_s23, 1  ;;  %p631_p6 = scmp.lt.s32.totalorder %s2820_s23, 3 }
  0x67   : > { %p632_p7 = pnand %p2323_p5, %p631_p6 }
  0x68   : > { %s638_s27 = sand.u32 (!%p632_p7), 1, %s2812_s21   ;;  %s3799_s1 = sld [smem:[#allocation4_spill]] (!%p632_p7) }
  0x69   : > { %635 = sbr.rel (%p632_p7) target bundleno = 2859 (0xb2b), region = 103  ;;  %s2825_s24 = smov (!%p632_p7), 88  }
  0x6a   : > { %s2724_s29 = smul.u32 (!%p632_p7), 608, %s638_s27  ;;  %s2826_s19 = smov (!%p632_p7), 87  }
  0x6b   : > { %s2827_s20 = smov (!%p632_p7), 103   ;;  %s2828_s26 = smov (!%p632_p7), 89  }
  0x6c   : > { %s3120_s30 = scalar_lea.vmem (!%p632_p7), [#allocation2], %s2724_s29  ;;  %s2829_s27 = smov (!%p632_p7), 105  }
  0x6d   : > { %s3792_s29 = smov (!%p632_p7), 119   ;;  %s3795_s21 = smov (!%p632_p7), 120  }
  0x6e   : > { %v2551_v12 = vld [vmem:[%s3120_s30 + $0x1c0] sm:$0xf]  ;;  %v2707_v14 = vld [vmem:[%s3120_s30 + $0x1c4] sm:$0xf]  ;;  %vm1165_vm0 = vcmask 1043456   ;;  %v3149_v42 = vld [vmem:[%s3120_s30 + $0x248] sm:$0xff] }
  0x6f   : > { %v2711_v13 = vld [vmem:[%s3120_s30 + $0x1dc] sm:$0xf0]  ;;  %v2553_v16 = vld [vmem:[%s3120_s30 + $0x1e0] sm:$0xf0]  ;;  %v2559_v38 = vld [vmem:[%s3120_s30 + $0x1c8] sm:$0xf]  ;;  %v1003_v46 = vunpack.c.l.b16 %v3149_v42 }
  0x70   : > { %v2552_v15 = vor.u32 %v2711_v13, %v2551_v12  ;;  %v765_v17 = vld [vmem:[%s3120_s30 + $0x240] sm:$0xff]  ;;  %v2556_v20 = vor.u32 %v2707_v14, %v2553_v16  ;;  %v2712_v41 = vld [vmem:[%s3120_s30 + $0x1e4] sm:$0xf0]  ;;  %vm1161_vm1 = vcmask 195584   ;;  %v2708_v61 = vld [vmem:[%s3120_s30 + $0x1cc] sm:$0xf] }
  0x71   : > { %v2519_v18 = vld [vmem:[%s3120_s30 + $0x180] sm:$0xf]  ;;  %v1001_v21 = vunpack.c.l.b16 %v765_v17  ;;  %v1002_v22 = vunpack.c.h.b16 %v765_v17  ;;  %v2699_v24 = vld [vmem:[%s3120_s30 + $0x184] sm:$0xf]  ;;  %v2560_v51 = vor.u32 %v2712_v41, %v2559_v38  ;;  %v1083_v52 = vpack.c.b16 %v1003_v46, %v1003_v46  ;;  %v2527_v55 = vld [vmem:[%s3120_s30 + $0x188] sm:$0xf] }
  0x72   : > { %v3131_v19 = vld [vmem:[%s3799_s1] sm:$0xff]  ;;  %1190 = vmatpush.bf16.msra.mxu0 %v2552_v15  ;;  %1216 = vmatpush.bf16.msra.mxu2 %v2556_v20  ;;  %v2704_v57 = vld [vmem:[%s3120_s30 + $0x1a4] sm:$0xf0]  ;;  %v2561_v62 = vld [vmem:[%s3120_s30 + $0x1e8] sm:$0xf0]  ;;  %s2824_s1 = smov 24  }
  0x73   : > { %v2703_v23 = vld [vmem:[%s3120_s30 + $0x19c] sm:$0xf0]  ;;  %v2521_v25 = vld [vmem:[%s3120_s30 + $0x1a0] sm:$0xf0]  ;;  %v1081_v29 = vpack.c.b16 %v1001_v21, %v1001_v21  ;;  %v1082_v30 = vpack.c.b16 %v1002_v22, %v1002_v22  ;;  %v777_v43 = vunpack.c.h.b16 %v3131_v19  ;;  %v2591_v58 = vld [vmem:[%s3120_s30 + $0x208] sm:$0xf]  ;;  %v2528_v2 = vor.u32 %v2704_v57, %v2527_v55 }
  0x74   : > { %v2583_v26 = vld [vmem:[%s3120_s30 + $0x200] sm:$0xf]  ;;  %v2715_v28 = vld [vmem:[%s3120_s30 + $0x204] sm:$0xf]  ;;  %v2520_v31 = vor.u32 %v2703_v23, %v2519_v18  ;;  %v2524_v32 = vor.u32 %v2699_v24, %v2521_v25  ;;  %v2720_v59 = vld [vmem:[%s3120_s30 + $0x224] sm:$0xf0]  ;;  %v2564_v7 = vor.u32 %v2708_v61, %v2561_v62 }
  0x75   : > { %v2719_v27 = vld [vmem:[%s3120_s30 + $0x21c] sm:$0xf0]  ;;  %v2585_v33 = vld [vmem:[%s3120_s30 + $0x220] sm:$0xf0]  ;;  %v1167_v39 = vsel %vm1165_vm0, %v1081_v29, 0  ;;  %v1170_v40 = vsel %vm1165_vm0, %v1082_v30, 0  ;;  %v3158_v56 = vpack.c.b16 %v777_v43, %v777_v43  ;;  %v2592_v3 = vor.u32 %v2720_v59, %v2591_v58 }
  0x76   : > { %v2487_v34 = vld [vmem:[%s3120_s30 + $0x140] sm:$0xf]  ;;  %v2691_v36 = vld [vmem:[%s3120_s30 + $0x144] sm:$0xf]  ;;  %1209 = vmatpush.bf16.msra.mxu1 %v1167_v39  ;;  %1235 = vmatpush.bf16.msra.mxu3 %v1170_v40  ;;  %v2584_v44 = vor.u32 %v2719_v27, %v2583_v26  ;;  %v2588_v45 = vor.u32 %v2715_v28, %v2585_v33  ;;  %v1173_v60 = vsel %vm1165_vm0, %v1083_v52, 0  ;;  %v3210_v61 = vld [vmem:[%s3120_s30 + $0x250] sm:$0xff] }
  0x77   : > { %v2695_v35 = vld [vmem:[%s3120_s30 + $0x15c] sm:$0xf0]  ;;  %v2489_v37 = vld [vmem:[%s3120_s30 + $0x160] sm:$0xf0]  ;;  %1191 = vmatpush.bf16.msra.mxu0 %v2520_v31  ;;  %1217 = vmatpush.bf16.msra.mxu2 %v2524_v32  ;;  %v2495_v8 = vld [vmem:[%s3120_s30 + $0x148] sm:$0xf]  ;;  %v1004_v32 = vunpack.c.h.b16 %v3149_v42 }
  0x78   : > { %v2488_v47 = vor.u32 %v2695_v35, %v2487_v34  ;;  %v2492_v48 = vor.u32 %v2691_v36, %v2489_v37  ;;  %v2455_v49 = vld [vmem:[%s3120_s30 + $0x100] sm:$0xf]  ;;  %v2683_v53 = vld [vmem:[%s3120_s30 + $0x104] sm:$0xf]  ;;  %v2696_v9 = vld [vmem:[%s3120_s30 + $0x164] sm:$0xf0] }
  0x79   : > { %v2687_v50 = vld [vmem:[%s3120_s30 + $0x11c] sm:$0xf0]  ;;  %v2457_v54 = vld [vmem:[%s3120_s30 + $0x120] sm:$0xf0]  ;;  %v2700_v10 = vld [vmem:[%s3120_s30 + $0x18c] sm:$0xf]  ;;  %v2496_v15 = vor.u32 %v2696_v9, %v2495_v8 }
  0x7a   : > { %1210 = vmatpush.bf16.msra.mxu1 %v2584_v44  ;;  %1236 = vmatpush.bf16.msra.mxu3 %v2588_v45  ;;  %v2456_v63 = vor.u32 %v2687_v50, %v2455_v49  ;;  %v2460_v0 = vor.u32 %v2683_v53, %v2457_v54  ;;  %v2423_v1 = vld [vmem:[%s3120_s30 + $0xc0] sm:$0xf]  ;;  %v2675_v5 = vld [vmem:[%s3120_s30 + $0xc4] sm:$0xf]  ;;  %v2529_v11 = vld [vmem:[%s3120_s30 + $0x1a8] sm:$0xf0]  ;;  %v1084_v45 = vpack.c.b16 %v1004_v32, %v1004_v32  ;;  %v776_v53 = vunpack.c.l.b16 %v3131_v19 }
  0x7b   : > { %1192 = vmatpush.bf16.msra.mxu0 %v2488_v47  ;;  %1218 = vmatpush.bf16.msra.mxu2 %v2492_v48  ;;  %v2679_v4 = vld [vmem:[%s3120_s30 + $0xdc] sm:$0xf0]  ;;  %v2425_v6 = vld [vmem:[%s3120_s30 + $0xe0] sm:$0xf0]  ;;  %v2532_v20 = vor.u32 %v2700_v10, %v2529_v11  ;;  %v2463_v21 = vld [vmem:[%s3120_s30 + $0x108] sm:$0xf]  ;;  %v1005_v10 = vunpack.c.l.b16 %v3210_v61  ;;  %v1006_v32 = vunpack.c.h.b16 %v3210_v61 }
  0x7c   : > { %v2424_v12 = vor.u32 %v2679_v4, %v2423_v1  ;;  %v2428_v13 = vor.u32 %v2675_v5, %v2425_v6  ;;  %v2391_v14 = vld [vmem:[%s3120_s30 + $0x80] sm:$0xf]  ;;  %v2667_v17 = vld [vmem:[%s3120_s30 + $0x84] sm:$0xf]  ;;  %v2688_v22 = vld [vmem:[%s3120_s30 + $0x124] sm:$0xf0]  ;;  %v3220_v4 = vpack.c.b16 %v776_v53, %v776_v53 }
  0x7d   : > { %2614 = vmatmul.msk.bf16.vlgmr.msra.gmra.mxu3 %vm1161_vm1, %v3158_v56  ;;  %2613 = vmatmul.msk.bf16.vlgmr.msra.gmra.mxu1 %vm1161_vm1, %v3158_v56  ;;  %v2671_v16 = vld [vmem:[%s3120_s30 + $0x9c] sm:$0xf0]  ;;  %v2393_v18 = vld [vmem:[%s3120_s30 + $0xa0] sm:$0xf0]  ;;  %v2692_v23 = vld [vmem:[%s3120_s30 + $0x14c] sm:$0xf]  ;;  %v2464_v28 = vor.u32 %v2688_v22, %v2463_v21 }
  0x7e   : > { %1242 = vmatpush.bf16.msrb.mxu1 %v2560_v51  ;;  %1261 = vmatpush.bf16.msrb.mxu3 %v1173_v60  ;;  %v2497_v24 = vld [vmem:[%s3120_s30 + $0x168] sm:$0xf0]  ;;  %v2392_v25 = vor.u32 %v2671_v16, %v2391_v14  ;;  %v2396_v26 = vor.u32 %v2667_v17, %v2393_v18  ;;  %v2359_v27 = vld [vmem:[%s3120_s30 + $0x40] sm:$0xf]  ;;  %v2659_v30 = vld [vmem:[%s3120_s30 + $0x44] sm:$0xf] }
  0x7f   : > { %1193 = vmatpush.bf16.msra.mxu0 %v2456_v63  ;;  %1219 = vmatpush.bf16.msra.mxu2 %v2460_v0  ;;  %v2663_v29 = vld [vmem:[%s3120_s30 + $0x5c] sm:$0xf0]  ;;  %v2361_v31 = vld [vmem:[%s3120_s30 + $0x60] sm:$0xf0]  ;;  %v2500_v33 = vor.u32 %v2692_v23, %v2497_v24  ;;  %v2431_v34 = vld [vmem:[%s3120_s30 + $0xc8] sm:$0xf] }
  0x80   : > { %v2680_v35 = vld [vmem:[%s3120_s30 + $0xe4] sm:$0xf0]  ;;  %v2684_v36 = vld [vmem:[%s3120_s30 + $0x10c] sm:$0xf]  ;;  %v2360_v38 = vor.u32 %v2663_v29, %v2359_v27  ;;  %v2364_v39 = vor.u32 %v2659_v30, %v2361_v31  ;;  %v2327_v40 = vld [vmem:[%s3120_s30] sm:$0xf] }
  0x81   : > { %v2465_v37 = vld [vmem:[%s3120_s30 + $0x128] sm:$0xf0]  ;;  %v2432_v41 = vor.u32 %v2680_v35, %v2431_v34  ;;  %v2655_v42 = vld [vmem:[%s3120_s30 + $0x1c] sm:$0xf0]  ;;  %v2651_v43 = vld [vmem:[%s3120_s30 + $0x4] sm:$0xf] }
  0x82   : > { %1243 = vmatpush.bf16.msrb.mxu1 %v2528_v2  ;;  %1262 = vmatpush.bf16.msrb.mxu3 %v2592_v3  ;;  %v2329_v44 = vld [vmem:[%s3120_s30 + $0x20] sm:$0xf0]  ;;  %v2468_v46 = vor.u32 %v2684_v36, %v2465_v37  ;;  %v2399_v47 = vld [vmem:[%s3120_s30 + $0x88] sm:$0xf]  ;;  %v2676_v49 = vld [vmem:[%s3120_s30 + $0xcc] sm:$0xf]  ;;  %v2328_v54 = vor.u32 %v2655_v42, %v2327_v40 }
  0x83   : > { %1194 = vmatpush.bf16.msra.mxu0 %v2424_v12  ;;  %1220 = vmatpush.bf16.msra.mxu2 %v2428_v13  ;;  %v2672_v48 = vld [vmem:[%s3120_s30 + $0xa4] sm:$0xf0]  ;;  %v2433_v50 = vld [vmem:[%s3120_s30 + $0xe8] sm:$0xf0]  ;;  %v2567_v51 = vld [vmem:[%s3120_s30 + $0x1d0] sm:$0xf]  ;;  %v2332_v55 = vor.u32 %v2651_v43, %v2329_v44  ;;  %v1086_v44 = vpack.c.b16 %v1006_v32, %v1006_v32 }
  0x84   : > { %v2713_v52 = vld [vmem:[%s3120_s30 + $0x1ec] sm:$0xf0]  ;;  %v2367_v57 = vld [vmem:[%s3120_s30 + $0x48] sm:$0xf]  ;;  %v2400_v58 = vor.u32 %v2672_v48, %v2399_v47  ;;  %v1176_v59 = vsel %vm1165_vm0, %v1084_v45, 0  ;;  %v2822_v62 = vmov 0   ;;  %v2436_v63 = vor.u32 %v2676_v49, %v2433_v50 }
  0x85   : > { %v2664_v60 = vld [vmem:[%s3120_s30 + $0x64] sm:$0xf0]  ;;  %2769 = vset.pattern.permute.xlu0 %v2822_v62  ;;  %v769_v19 = vld [vmem:[%s3777_s2] sm:$0xff]  ;;  %v2568_v0 = vor.u32 %v2713_v52, %v2567_v51  ;;  %v2668_v1 = vld [vmem:[%s3120_s30 + $0x8c] sm:$0xf]  ;;  %2785 = vset.pattern.permute.xlu2 %v2822_v62  ;;  %s3794_s0 = smov 121  }
  0x86   : > { %1268 = vmatpush.bf16.msra.mxu3 %v2564_v7  ;;  %1244 = vmatpush.bf16.msrb.mxu1 %v2496_v15  ;;  %v2716_v2 = vld [vmem:[%s3120_s30 + $0x20c] sm:$0xf]  ;;  %v2535_v6 = vld [vmem:[%s3120_s30 + $0x190] sm:$0xf]  ;;  %v2709_v8 = vld [vmem:[%s3120_s30 + $0x1d4] sm:$0xf]  ;;  %v2368_v11 = vor.u32 %v2664_v60, %v2367_v57 }
  0x87   : > { %1195 = vmatpush.bf16.msra.mxu0 %v2392_v25  ;;  %1221 = vmatpush.bf16.msra.mxu2 %v2396_v26  ;;  %v2593_v3 = vld [vmem:[%s3120_s30 + $0x228] sm:$0xf0]  ;;  %v2705_v7 = vld [vmem:[%s3120_s30 + $0x1ac] sm:$0xf0]  ;;  %v2569_v9 = vld [vmem:[%s3120_s30 + $0x1f0] sm:$0xf0]  ;;  %v1085_v25 = vpack.c.b16 %v1005_v10, %v1005_v10 }
  0x88   : > { %772 = vperm.xlu0 %2769, %v769_v19   ;;  %v2401_v5 = vld [vmem:[%s3120_s30 + $0xa8] sm:$0xf0]  ;;  %v2596_v12 = vor.u32 %v2716_v2, %v2593_v3  ;;  %v2536_v14 = vor.u32 %v2705_v7, %v2535_v6  ;;  %v2335_v15 = vld [vmem:[%s3120_s30 + $0x8] sm:$0xf]  ;;  %v2572_v18 = vor.u32 %v2709_v8, %v2569_v9  ;;  %v2503_v21 = vld [vmem:[%s3120_s30 + $0x150] sm:$0xf] }
  0x89   : > { %v2404_v13 = vor.u32 %v2668_v1, %v2401_v5  ;;  %v2656_v16 = vld [vmem:[%s3120_s30 + $0x24] sm:$0xf0]  ;;  %v2660_v17 = vld [vmem:[%s3120_s30 + $0x4c] sm:$0xf]  ;;  %v2697_v22 = vld [vmem:[%s3120_s30 + $0x16c] sm:$0xf0] }
  0x8a   : > { %1269 = vmatpush.bf16.msra.mxu3 %v2532_v20  ;;  %1245 = vmatpush.bf16.msrb.mxu1 %v2464_v28  ;;  %v2369_v20 = vld [vmem:[%s3120_s30 + $0x68] sm:$0xf0]  ;;  %v2701_v23 = vld [vmem:[%s3120_s30 + $0x194] sm:$0xf]  ;;  %v2336_v26 = vor.u32 %v2656_v16, %v2335_v15  ;;  %v2504_v28 = vor.u32 %v2697_v22, %v2503_v21  ;;  %v2471_v31 = vld [vmem:[%s3120_s30 + $0x110] sm:$0xf] }
  0x8b   : > { %1196 = vmatpush.bf16.msra.mxu0 %v2360_v38  ;;  %1222 = vmatpush.bf16.msra.mxu2 %v2364_v39  ;;  %v2537_v24 = vld [vmem:[%s3120_s30 + $0x1b0] sm:$0xf0]  ;;  %v2372_v27 = vor.u32 %v2660_v17, %v2369_v20  ;;  %v2652_v29 = vld [vmem:[%s3120_s30 + $0xc] sm:$0xf]  ;;  %v2689_v34 = vld [vmem:[%s3120_s30 + $0x12c] sm:$0xf0] }
  0x8c   : > { %v2337_v30 = vld [vmem:[%s3120_s30 + $0x28] sm:$0xf0]  ;;  %v2693_v35 = vld [vmem:[%s3120_s30 + $0x154] sm:$0xf]  ;;  %v1179_v37 = vsel %vm1165_vm0, %v1085_v25, 0  ;;  %v2472_v43 = vor.u32 %v2689_v34, %v2471_v31  ;;  %v768_v5 = vld [vmem:[%s3120_s30 + $0x258] sm:$0xff] }
  0x8d   : > { %2615 = vmatmul.msk.bf16.vlgmr.msrb.gmra.mxu3 %vm1161_vm1, %v3158_v56  ;;  %v2505_v36 = vld [vmem:[%s3120_s30 + $0x170] sm:$0xf0]  ;;  %v2575_v38 = vld [vmem:[%s3120_s30 + $0x1d8] sm:$0xf]  ;;  %v2599_v40 = vld [vmem:[%s3120_s30 + $0x210] sm:$0xf]  ;;  %v2340_v42 = vor.u32 %v2652_v29, %v2337_v30  ;;  %v1008_v29 = vunpack.c.h.b16 %v768_v5 }
  0x8e   : > { %1270 = vmatpush.bf16.msra.mxu3 %v2500_v33  ;;  %1246 = vmatpush.bf16.msrb.mxu1 %v2432_v41  ;;  %v2540_v33 = vor.u32 %v2701_v23, %v2537_v24  ;;  %v2714_v39 = vld [vmem:[%s3120_s30 + $0x1f4] sm:$0xf0]  ;;  %v2721_v41 = vld [vmem:[%s3120_s30 + $0x22c] sm:$0xf0]  ;;  %v2508_v45 = vor.u32 %v2693_v35, %v2505_v36  ;;  %v2685_v49 = vld [vmem:[%s3120_s30 + $0x114] sm:$0xf] }
  0x8f   : > { %1197 = vmatpush.bf16.msra.mxu0 %v2328_v54  ;;  %1223 = vmatpush.bf16.msra.mxu2 %v2332_v55  ;;  %v2439_v47 = vld [vmem:[%s3120_s30 + $0xd0] sm:$0xf]  ;;  %v2473_v50 = vld [vmem:[%s3120_s30 + $0x130] sm:$0xf0]  ;;  %v2543_v51 = vld [vmem:[%s3120_s30 + $0x198] sm:$0xf]  ;;  %v2600_v53 = vor.u32 %v2721_v41, %v2599_v40 }
  0x90   : > { %v2681_v48 = vld [vmem:[%s3120_s30 + $0xec] sm:$0xf0]  ;;  %v2706_v52 = vld [vmem:[%s3120_s30 + $0x1b4] sm:$0xf0]  ;;  %v1182_v55 = vsel %vm1165_vm0, %v1086_v44, 0  ;;  %vm1642_vm6 = vcmask 711680  }
  0x91   : > { %v2440_v54 = vor.u32 %v2681_v48, %v2439_v47  ;;  %v2717_v57 = vld [vmem:[%s3120_s30 + $0x214] sm:$0xf]  ;;  %v2544_v60 = vor.u32 %v2706_v52, %v2543_v51  ;;  %v2407_v61 = vld [vmem:[%s3120_s30 + $0x90] sm:$0xf]  ;;  %v2698_v1 = vld [vmem:[%s3120_s30 + $0x174] sm:$0xf0] }
  0x92   : > { %1271 = vmatpush.bf16.msra.mxu3 %v2468_v46  ;;  %1247 = vmatpush.bf16.msrb.mxu1 %v2400_v58  ;;  %v2576_v46 = vor.u32 %v2714_v39, %v2575_v38  ;;  %v2601_v58 = vld [vmem:[%s3120_s30 + $0x230] sm:$0xf0]  ;;  %v2673_v62 = vld [vmem:[%s3120_s30 + $0xac] sm:$0xf0]  ;;  %v2710_v16 = vld [vmem:[%s3120_s30 + $0x1dc] sm:$0xf] }
  0x93   : > { %1287 = vmatpush.bf16.msrb.mxu0 %v1176_v59  ;;  %1294 = vmatpush.bf16.msrb.mxu2 %v2568_v0  ;;  %v2476_v59 = vor.u32 %v2685_v49, %v2473_v50  ;;  %v2677_v19 = vld [vmem:[%s3120_s30 + $0xd4] sm:$0xf]  ;;  %v2511_v0 = vld [vmem:[%s3120_s30 + $0x158] sm:$0xf]  ;;  %v2604_v2 = vor.u32 %v2717_v57, %v2601_v58  ;;  %v2408_v3 = vor.u32 %v2673_v62, %v2407_v61  ;;  %v2375_v8 = vld [vmem:[%s3120_s30 + $0x50] sm:$0xf] }
  0x94   : > { %1198 = vmatmul.bf16.vlgmr.msra.gmra.mxu0 %v3220_v4  ;;  %1224 = vmatmul.bf16.vlgmr.msra.gmra.mxu2 %v3220_v4  ;;  %v2512_v7 = vor.u32 %v2698_v1, %v2511_v0  ;;  %v2665_v9 = vld [vmem:[%s3120_s30 + $0x6c] sm:$0xf0]  ;;  %v2669_v10 = vld [vmem:[%s3120_s30 + $0x94] sm:$0xf]  ;;  %v2577_v17 = vld [vmem:[%s3120_s30 + $0x1f8] sm:$0xf0] }
  0x95   : > { %v2376_v15 = vor.u32 %v2665_v9, %v2375_v8  ;;  %v2343_v21 = vld [vmem:[%s3120_s30 + $0x10] sm:$0xf]  ;;  %v2661_v23 = vld [vmem:[%s3120_s30 + $0x54] sm:$0xf]  ;;  %v2447_v25 = vld [vmem:[%s3120_s30 + $0xd8] sm:$0xf] }
  0x96   : > { %1272 = vmatpush.bf16.msra.mxu3 %v2436_v63  ;;  %1248 = vmatpush.bf16.msrb.mxu1 %v2368_v11  ;;  %v2441_v63 = vld [vmem:[%s3120_s30 + $0xf0] sm:$0xf0]  ;;  %v2657_v22 = vld [vmem:[%s3120_s30 + $0x2c] sm:$0xf0]  ;;  %v2702_v31 = vld [vmem:[%s3120_s30 + $0x19c] sm:$0xf] }
  0x97   : > { %1288 = vmatpush.bf16.msrb.mxu0 %v2596_v12  ;;  %1295 = vmatpush.bf16.msrb.mxu2 %v2536_v14  ;;  %v2444_v6 = vor.u32 %v2677_v19, %v2441_v63  ;;  %v2409_v11 = vld [vmem:[%s3120_s30 + $0xb0] sm:$0xf0]  ;;  %v2479_v12 = vld [vmem:[%s3120_s30 + $0x118] sm:$0xf]  ;;  %v1007_v14 = vunpack.c.l.b16 %v768_v5  ;;  %v2344_v30 = vor.u32 %v2657_v22, %v2343_v21  ;;  %v2545_v32 = vld [vmem:[%s3120_s30 + $0x1b8] sm:$0xf0] }
  0x98   : > { %v2377_v24 = vld [vmem:[%s3120_s30 + $0x70] sm:$0xf0]  ;;  %v2674_v38 = vld [vmem:[%s3120_s30 + $0xb4] sm:$0xf0]  ;;  %v2548_v39 = vor.u32 %v2702_v31, %v2545_v32  ;;  %v2694_v44 = vld [vmem:[%s3120_s30 + $0x15c] sm:$0xf] }
  0x99   : > { %v2653_v35 = vld [vmem:[%s3120_s30 + $0x14] sm:$0xf]  ;;  %v2607_v41 = vld [vmem:[%s3120_s30 + $0x218] sm:$0xf]  ;;  %v2481_v57 = vld [vmem:[%s3120_s30 + $0x138] sm:$0xf0] }
  0x9a   : > { %1273 = vmatpush.bf16.msra.mxu3 %v2404_v13  ;;  %1249 = vmatpush.bf16.msrb.mxu1 %v2336_v26  ;;  %v2690_v13 = vld [vmem:[%s3120_s30 + $0x134] sm:$0xf0]  ;;  %v2345_v36 = vld [vmem:[%s3120_s30 + $0x30] sm:$0xf0]  ;;  %v2678_v19 = vld [vmem:[%s3120_s30 + $0xdc] sm:$0xf] }
  0x9b   : > { %1320 = vmatpush.bf16.msra.mxu0 %v2572_v18  ;;  %1296 = vmatpush.bf16.msrb.mxu2 %v2504_v28  ;;  %v2412_v18 = vor.u32 %v2669_v10, %v2409_v11  ;;  %v2480_v20 = vor.u32 %v2690_v13, %v2479_v12  ;;  %v2682_v26 = vld [vmem:[%s3120_s30 + $0xf4] sm:$0xf0]  ;;  %v1087_v28 = vpack.c.b16 %v1007_v14, %v1007_v14  ;;  %v2449_v63 = vld [vmem:[%s3120_s30 + $0xf8] sm:$0xf0]  ;;  %vm1677_vm9 = vcmask 719872   ;;  %s2838_s17 = smov 112  }
  0x9c   : > { %v2448_v34 = vor.u32 %v2682_v26, %v2447_v25  ;;  %v2383_v48 = vld [vmem:[%s3120_s30 + $0x58] sm:$0xf]  ;;  %v2452_v1 = vor.u32 %v2678_v19, %v2449_v63  ;;  %v2654_v9 = vld [vmem:[%s3120_s30 + $0x1c] sm:$0xf]  ;;  %vm1629_vm10 = vcmask 728064   ;;  %vm1616_vm12 = vcmask 842752  }
  0x9d   : > { %1250 = vmatmul.bf16.vlgmr.msrb.gmra.mxu1 %v3220_v4  ;;  %v1185_v40 = vsel %vm1165_vm0, %v1087_v28, 0  ;;  %v2666_v49 = vld [vmem:[%s3120_s30 + $0x74] sm:$0xf0]  ;;  %v2353_v10 = vld [vmem:[%s3120_s30 + $0x38] sm:$0xf0]  ;;  %vm1666_vm14 = vcmask 850944  }
  0x9e   : > { %1274 = vmatpush.bf16.msra.mxu3 %v2372_v27  ;;  %1313 = vmatpush.bf16.msra.mxu1 %v1179_v37  ;;  %v2580_v27 = vor.u32 %v2710_v16, %v2577_v17  ;;  %v2415_v37 = vld [vmem:[%s3120_s30 + $0x98] sm:$0xf]  ;;  %v2384_v58 = vor.u32 %v2666_v49, %v2383_v48  ;;  %v2356_v11 = vor.u32 %v2654_v9, %v2353_v10  ;;  %vm1603_vm15 = vcmask 859136   ;;  %s2839_s18 = smov 113  }
  0x9f   : > { %1321 = vmatpush.bf16.msra.mxu0 %v2540_v33  ;;  %1297 = vmatpush.bf16.msrb.mxu2 %v2472_v43  ;;  %v2380_v33 = vor.u32 %v2661_v23, %v2377_v24  ;;  %v1088_v43 = vpack.c.b16 %v1008_v29, %v1008_v29  ;;  %v2416_v47 = vor.u32 %v2674_v38, %v2415_v37 }
  0xa1   : > { %v1188_v52 = vsel %vm1165_vm0, %v1088_v43, 0 }
  0xa2   : > { %1275 = vmatpush.bf16.msra.mxu3 %v2340_v42  ;;  %1314 = vmatpush.bf16.msra.mxu1 %v2600_v53  ;;  %v2722_v42 = vld [vmem:[%s3120_s30 + $0x234] sm:$0xf0]  ;;  %v2718_v53 = vld [vmem:[%s3120_s30 + $0x21c] sm:$0xf] }
  0xa3   : > { %1322 = vmatpush.bf16.msra.mxu0 %v2508_v45  ;;  %1298 = vmatpush.bf16.msrb.mxu2 %v2440_v54  ;;  %v2513_v45 = vld [vmem:[%s3120_s30 + $0x178] sm:$0xf0]  ;;  %v2608_v50 = vor.u32 %v2722_v42, %v2607_v41 }
  0xa4   : > { %2616 = vmatmul.msk.bf16.vlgmr.msrb.gmra.mxu0 %vm1161_vm1, %v3158_v56  ;;  %v2516_v51 = vor.u32 %v2694_v44, %v2513_v45  ;;  %v2609_v54 = vld [vmem:[%s3120_s30 + $0x238] sm:$0xf0] }
  0xa5   : > { %1276 = vmatmul.bf16.vlgmr.msra.gmra.mxu3 %v3220_v4  ;;  %v2612_v61 = vor.u32 %v2718_v53, %v2609_v54 }
  0xa6   : > { %1346 = vmatpush.bf16.msrb.mxu3 %v2576_v46  ;;  %1339 = vmatpush.bf16.msrb.mxu1 %v1182_v55  ;;  %v2348_v46 = vor.u32 %v2653_v35, %v2345_v36  ;;  %v2686_v55 = vld [vmem:[%s3120_s30 + $0x11c] sm:$0xf] }
  0xa7   : > { %1323 = vmatpush.bf16.msra.mxu0 %v2476_v59  ;;  %1299 = vmatpush.bf16.msrb.mxu2 %v2408_v3  ;;  %v2351_v59 = vld [vmem:[%s3120_s30 + $0x18] sm:$0xf]  ;;  %v2484_v62 = vor.u32 %v2686_v55, %v2481_v57  ;;  %v2417_v3 = vld [vmem:[%s3120_s30 + $0xb8] sm:$0xf0] }
  0xaa   : > { %1347 = vmatpush.bf16.msrb.mxu3 %v2544_v60  ;;  %1340 = vmatpush.bf16.msrb.mxu1 %v2604_v2  ;;  %v2658_v60 = vld [vmem:[%s3120_s30 + $0x34] sm:$0xf0]  ;;  %v2670_v2 = vld [vmem:[%s3120_s30 + $0x9c] sm:$0xf] }
  0xab   : > { %1324 = vmatpush.bf16.msra.mxu0 %v2444_v6  ;;  %1300 = vmatpush.bf16.msrb.mxu2 %v2376_v15  ;;  %v2352_v0 = vor.u32 %v2658_v60, %v2351_v59  ;;  %v2420_v5 = vor.u32 %v2670_v2, %v2417_v3  ;;  %v2662_v6 = vld [vmem:[%s3120_s30 + $0x5c] sm:$0xf]  ;;  %v2823_v3 = vmov 8192.0  }
  0xac   : > { %2786 = vrcp.f32 %v2823_v3 }
  0xad   : > { %2617 = vmatmul.msk.bf16.vlgmr.msra.gmra.mxu1 %vm1161_vm1, %v3158_v56 }
  0xae   : > { %1348 = vmatpush.bf16.msrb.mxu3 %v2512_v7  ;;  %1372 = vmatpush.bf16.msra.mxu1 %v2580_v27  ;;  %v2385_v7 = vld [vmem:[%s3120_s30 + $0x78] sm:$0xf0]  ;;  %s3793_s30 = smov 104  }
  0xaf   : > { %1325 = vmatpush.bf16.msra.mxu0 %v2412_v18  ;;  %1301 = vmatpush.bf16.msrb.mxu2 %v2344_v30  ;;  %v2388_v8 = vor.u32 %v2662_v6, %v2385_v7 }
  0xb2   : > { %1349 = vmatpush.bf16.msrb.mxu3 %v2480_v20  ;;  %1302 = vmatmul.bf16.vlgmr.msrb.gmra.mxu2 %v3220_v4 }
  0xb3   : > { %1326 = vmatpush.bf16.msra.mxu0 %v2380_v33  ;;  %1365 = vmatpush.bf16.msra.mxu2 %v1185_v40 }
  0xb4   : > { %1373 = vmatpush.bf16.msra.mxu1 %v2548_v39 }
  0xb6   : > { %1350 = vmatpush.bf16.msrb.mxu3 %v2448_v34 }
  0xb7   : > { %1327 = vmatpush.bf16.msra.mxu0 %v2348_v46  ;;  %1366 = vmatpush.bf16.msra.mxu2 %v2608_v50 }
  0xb8   : > { %1374 = vmatpush.bf16.msra.mxu1 %v2516_v51 }
  0xba   : > { %1351 = vmatpush.bf16.msrb.mxu3 %v2416_v47  ;;  %1328 = vmatmul.bf16.vlgmr.msra.gmra.mxu0 %v3220_v4 }
  0xbb   : > { %1391 = vmatpush.bf16.msrb.mxu0 %v1188_v52 }
  0xbc   : > { %1375 = vmatpush.bf16.msra.mxu1 %v2484_v62 }
  0xbd   : > { %2618 = vmatmul.msk.bf16.vlgmr.msrb.gmra.mxu1 %vm1161_vm1, %v3158_v56 }
  0xbe   : > { %1352 = vmatpush.bf16.msrb.mxu3 %v2384_v58 }
  0xbf   : > { %1392 = vmatpush.bf16.msrb.mxu0 %v2612_v61 }
  0xc0   : > { %1376 = vmatpush.bf16.msra.mxu1 %v2452_v1 }
  0xc2   : > { %1353 = vmatpush.bf16.msrb.mxu3 %v2352_v0  ;;  %2619 = vmatmul.msk.bf16.vlgmr.msra.gmra.mxu2 %vm1161_vm1, %v3158_v56 }
  0xc4   : > { %1377 = vmatpush.bf16.msra.mxu1 %v2420_v5  ;;  %v2787_v5 = vpop.eup %2786 }
  0xc5   : > { %1354 = vmatmul.bf16.vlgmr.msrb.gmra.mxu3 %v3220_v4  ;;  %v1430_v6 = vmul.f32 8192.0, %v2787_v5  ;;  %vm1434_vm2 = vweird.f32 %v2787_v5 }
  0xc7   : > { %v1431_v7 = vsub.f32 1.0, %v1430_v6  ;;  %v1402_v6 = vld [vmem:[%s3778_s3 + $0x20] sm:$0xff] }
  0xc8   : > { %1378 = vmatpush.bf16.msra.mxu1 %v2388_v8 }
  0xc9   : > { %v1432_v10 = vmul.f32 %v2787_v5, %v1431_v7  ;;  %v1404_v7 = vld [vmem:[%s3778_s3 + $0x30] sm:$0xff] }
  0xca   : > { %2620 = vmatmul.msk.bf16.vlgmr.msrb.gmra.mxu0 %vm1161_vm1, %v3158_v56 }
  0xcc   : > { %1379 = vmatpush.bf16.msra.mxu1 %v2356_v11 }
  0xcf   : > { %1380 = vmatmul.bf16.vlgmr.msra.gmra.mxu1 %v3220_v4 }
  0xfa   : > { %v1212_v12 = vpop.f32.mrf.mxu1  ;;  %v773_v31 = vpop.permute.xlu0 %772 }
 0x100   : > { %v1238_v13 = vpop.f32.mrf.mxu3 }
 0x102   : > { %v1214_v14 = vpop.f32.mrf.mxu1 }
 0x108   : > { %v1240_v15 = vpop.f32.mrf.mxu3 }
 0x110   : > { %v1264_v17 = vpop.f32.mrf.mxu3 }
 0x111   : > { %v1199_v16 = vpop.f32.mrf.mxu0 }
 0x112   : > { %v1200_v33 = vadd.f32 %v1199_v16, %v773_v31 }
 0x114   : > { %v1213_v38 = vadd.f32 %v1212_v12, %v1200_v33 }
 0x117   : > { %v1225_v18 = vpop.f32.mrf.mxu2 }
 0x118   : > { %v1266_v22 = vpop.f32.mrf.mxu3  ;;  %v1226_v32 = vadd.f32 %v1225_v18, %v773_v31 }
 0x119   : > { %v1201_v20 = vpop.f32.mrf.mxu0 }
 0x11a   : > { %v1251_v21 = vpop.f32.mrf.mxu1  ;;  %v1239_v35 = vadd.f32 %v1238_v13, %v1226_v32  ;;  %v1433_v13 = vadd.f32 %v2787_v5, %v1432_v10  ;;  %v1406_v10 = vld [vmem:[%s3778_s3 + $0x40] sm:$0xff] }
 0x11b   : > { %v1252_v36 = vadd.f32 %v1251_v21, %v773_v31 }
 0x11c   : > { %v1414_v41 = vadd.f32 %v1239_v35, %v1213_v38  ;;  %v1435_v16 = vsel %vm1434_vm2, %v2787_v5, %v1433_v13  ;;  %v1400_v5 = vld [vmem:[%s3778_s3 + $0x10] sm:$0xff]  ;;  %vm1655_vm2 = vcmask 982016  }
 0x11d   : > { %v1265_v42 = vadd.f32 %v1264_v17, %v1252_v36 }
 0x11f   : > { %v1227_v23 = vpop.f32.mrf.mxu2  ;;  %v1415_v47 = vadd.f32 %v1414_v41, %v1265_v42 }
 0x121   : > { %v1290_v25 = vpop.f32.mrf.mxu0 }
 0x122   : > { %v1253_v24 = vpop.f32.mrf.mxu1 }
 0x128   : > { %v1277_v26 = vpop.f32.mrf.mxu3 }
 0x129   : > { %v1292_v28 = vpop.f32.mrf.mxu0  ;;  %v1278_v39 = vadd.f32 %v1277_v26, %v773_v31 }
 0x12a   : > { %v1316_v27 = vpop.f32.mrf.mxu1 }
 0x12b   : > { %v1291_v44 = vadd.f32 %v1290_v25, %v1278_v39 }
 0x12d   : > { %v1416_v51 = vadd.f32 %v1415_v47, %v1291_v44 }
 0x130   : > { %v1279_v56 = vpop.f32.mrf.mxu3 }
 0x132   : > { %v1318_v29 = vpop.f32.mrf.mxu1 }
 0x135   : > { %v1303_v4 = vpop.f32.mrf.mxu2 }
 0x136   : > { %v1304_v43 = vadd.f32 %v1303_v4, %v773_v31 }
 0x137   : > { %v1329_v30 = vpop.f32.mrf.mxu0 }
 0x138   : > { %v1330_v48 = vadd.f32 %v1329_v30, %v773_v31  ;;  %v1317_v49 = vadd.f32 %v1316_v27, %v1304_v43 }
 0x13a   : > { %v1342_v34 = vpop.f32.mrf.mxu1  ;;  %v1417_v55 = vadd.f32 %v1416_v51, %v1317_v49 }
 0x13b   : > { %v1343_v54 = vadd.f32 %v1342_v34, %v1330_v48 }
 0x13d   : > { %v1305_v40 = vpop.f32.mrf.mxu2  ;;  %v1418_v60 = vadd.f32 %v1417_v55, %v1343_v54 }
 0x13f   : > { %v1331_v37 = vpop.f32.mrf.mxu0 }
 0x142   : > { %v1344_v45 = vpop.f32.mrf.mxu1 }
 0x145   : > { %v1368_v53 = vpop.f32.mrf.mxu2 }
 0x147   : > { %v1394_v50 = vpop.f32.mrf.mxu0 }
 0x148   : > { %v1355_v46 = vpop.f32.mrf.mxu3 }
 0x149   : > { %v1356_v52 = vadd.f32 %v1355_v46, %v773_v31 }
 0x14b   : > { %v1369_v57 = vadd.f32 %v1368_v53, %v1356_v52 }
 0x14c   : > { %v1381_v59 = vpop.f32.mrf.mxu1 }
 0x14d   : > { %v1382_v61 = vadd.f32 %v1381_v59, %v773_v31  ;;  %v1419_v19 = vadd.f32 %v1418_v60, %v1369_v57  ;;  %v1370_v0 = vpop.f32.mrf.mxu2  ;;  %v1403_v59 = vld [vmem:[%s3778_s3 + $0x28] sm:$0xff]  ;;  %v1405_v60 = vld [vmem:[%s3778_s3 + $0x38] sm:$0xff] }
 0x14f   : > { %v1396_v62 = vpop.f32.mrf.mxu0  ;;  %v1395_v63 = vadd.f32 %v1394_v50, %v1382_v61 }
 0x150   : > { %v1357_v58 = vpop.f32.mrf.mxu3  ;;  %v1407_v62 = vld [vmem:[%s3778_s3 + $0x48] sm:$0xff] }
 0x151   : > { %v1420_v1 = vadd.f32 %v1419_v19, %v1395_v63  ;;  %v1401_v58 = vld [vmem:[%s3778_s3 + $0x18] sm:$0xff] }
 0x152   : > { %v1409_v19 = vld [vmem:[%s3778_s3 + $0x58] sm:$0xff] }
 0x153   : > { %1421 = vadd.xlane.f32.xlu0 %v1420_v1 }
 0x154   : > { %v1383_v2 = vpop.f32.mrf.mxu1 }
 0x1c6   : > { %v1422_v8 = vpop.xlane.xlu0 %1421 }
 0x1c7   : > { %v1423_v9 = vrot.slane %v1422_v8, 4 }
 0x1c9   : > { %v1424_v11 = vadd.f32 %v1423_v9, %v1422_v8  ;;  %v1411_v8 = vld [vmem:[%s3778_s3 + $0x68] sm:$0xff]  ;;  %v1413_v9 = vld [vmem:[%s3778_s3 + $0x78] sm:$0xff] }
 0x1cb   : > { %v1425_v12 = vrot.slane %v1424_v11, 2 }
 0x1cd   : > { %v1426_v14 = vadd.f32 %v1425_v12, %v1424_v11 }
 0x1cf   : > { %v1427_v15 = vrot.slane %v1426_v14, 1 }
 0x1d1   : > { %v1428_v17 = vadd.f32 %v1427_v15, %v1426_v14 }
 0x1d3   : > { %v1436_v18 = vmul.f32 %v1435_v16, %v1428_v17 }
 0x1d5   : > { %v1437_v20 = vsub.f32 %v1213_v38, %v1436_v18  ;;  %v1438_v21 = vsub.f32 %v1239_v35, %v1436_v18  ;;  %v1439_v22 = vsub.f32 %v1265_v42, %v1436_v18  ;;  %v1440_v23 = vsub.f32 %v1291_v44, %v1436_v18 }
 0x1d6   : > { %v1441_v26 = vsub.f32 %v1317_v49, %v1436_v18  ;;  %v1442_v56 = vsub.f32 %v1343_v54, %v1436_v18  ;;  %v1443_v4 = vsub.f32 %v1369_v57, %v1436_v18  ;;  %v1444_v33 = vsub.f32 %v1395_v63, %v1436_v18  ;;  %v1399_v57 = vld [vmem:[%s3778_s3 + $0x8] sm:$0xff]  ;;  %v1398_v63 = vld [vmem:[%s3778_s3] sm:$0xff] }
 0x1d7   : > { %v1445_v24 = vmul.f32 %v1437_v20, %v1437_v20  ;;  %v1446_v25 = vmul.f32 %v1438_v21, %v1438_v21  ;;  %v1447_v27 = vmul.f32 %v1439_v22, %v1439_v22  ;;  %v1448_v29 = vmul.f32 %v1440_v23, %v1440_v23 }
 0x1d8   : > { %v1449_v31 = vmul.f32 %v1441_v26, %v1441_v26  ;;  %v1450_v34 = vmul.f32 %v1442_v56, %v1442_v56  ;;  %v1451_v37 = vmul.f32 %v1443_v4, %v1443_v4  ;;  %v1452_v38 = vmul.f32 %v1444_v33, %v1444_v33 }
 0x1d9   : > { %v1453_v28 = vadd.f32 %v1446_v25, %v1445_v24  ;;  %v1412_v24 = vld [vmem:[%s3778_s3 + $0x70] sm:$0xff] }
 0x1db   : > { %v1454_v30 = vadd.f32 %v1453_v28, %v1447_v27 }
 0x1dd   : > { %v1455_v32 = vadd.f32 %v1454_v30, %v1448_v29 }
 0x1df   : > { %v1456_v36 = vadd.f32 %v1455_v32, %v1449_v31 }
 0x1e1   : > { %v1457_v39 = vadd.f32 %v1456_v36, %v1450_v34 }
 0x1e3   : > { %v1458_v35 = vadd.f32 %v1457_v39, %v1451_v37 }
 0x1e5   : > { %v1459_v40 = vadd.f32 %v1458_v35, %v1452_v38 }
 0x1e7   : > { %1460 = vadd.xlane.f32.xlu1 %v1459_v40 }
 0x25a   : > { %v1461_v41 = vpop.xlane.xlu1 %1460 }
 0x25b   : > { %v1462_v42 = vrot.slane %v1461_v41, 4 }
 0x25d   : > { %v1463_v43 = vadd.f32 %v1462_v42, %v1461_v41 }
 0x25f   : > { %v1464_v44 = vrot.slane %v1463_v43, 2 }
 0x261   : > { %v1465_v45 = vadd.f32 %v1464_v44, %v1463_v43 }
 0x263   : > { %v1466_v46 = vrot.slane %v1465_v45, 1 }
 0x265   : > { %v1467_v47 = vadd.f32 %v1466_v46, %v1465_v45 }
 0x267   : > { %v1468_v48 = vmul.f32 %v1467_v47, %v1435_v16 }
 0x269   : > { %v1469_v49 = vadd.f32 1e-05, %v1468_v48 }
 0x26b   : > { %2788 = vrsqrt.f32 %v1469_v49  ;;  %vm1476_vm4 = vweird.f32 %v1469_v49 }
 0x271   : > { %v2789_v50 = vpop.eup %2788 }
 0x272   : > { %v1471_v51 = vmul.f32 %v2789_v50, %v1469_v49  ;;  %vm1477_vm3 = vweird.f32 %v2789_v50 }
 0x273   : > { %vm1478_vm5 = vmor %vm1476_vm4, %vm1477_vm3  ;;  %vm1575_vm3 = vcmask 990208   ;;  %vm1688_vm4 = vcmask 588800  }
 0x274   : > { %v1472_v52 = vmul.f32 %v2789_v50, %v1471_v51 }
 0x276   : > { %v1473_v53 = vmul.f32 0.5, %v1472_v52 }
 0x278   : > { %v1474_v54 = vsub.f32 1.5, %v1473_v53 }
 0x27a   : > { %v1475_v55 = vmul.f32 %v2789_v50, %v1474_v54 }
 0x27c   : > { %v1479_v61 = vsel %vm1478_vm5, %v2789_v50, %v1475_v55 }
 0x27d   : > { %v1481_v0 = vmul.f32 %v1479_v61, %v1438_v21  ;;  %v1483_v1 = vmul.f32 %v1479_v61, %v1440_v23  ;;  %v1485_v2 = vmul.f32 %v1479_v61, %v1442_v56  ;;  %v1487_v3 = vmul.f32 %v1479_v61, %v1444_v33  ;;  %v1408_v21 = vld [vmem:[%s3778_s3 + $0x50] sm:$0xff]  ;;  %v1410_v23 = vld [vmem:[%s3778_s3 + $0x60] sm:$0xff] }
 0x27e   : > { %v1480_v11 = vmul.f32 %v1479_v61, %v1437_v20  ;;  %v1482_v12 = vmul.f32 %v1479_v61, %v1439_v22  ;;  %v1484_v13 = vmul.f32 %v1479_v61, %v1441_v26  ;;  %v1486_v14 = vmul.f32 %v1479_v61, %v1443_v4 }
 0x27f   : > { %v1489_v15 = vmul.f32 %v1481_v0, %v1399_v57  ;;  %v1491_v16 = vmul.f32 %v1483_v1, %v1401_v58  ;;  %v1493_v17 = vmul.f32 %v1485_v2, %v1403_v59  ;;  %v1495_v18 = vmul.f32 %v1487_v3, %v1405_v60 }
 0x280   : > { %v1488_v20 = vmul.f32 %v1480_v11, %v1398_v63  ;;  %v1490_v22 = vmul.f32 %v1482_v12, %v1400_v5  ;;  %v1492_v25 = vmul.f32 %v1484_v13, %v1402_v6  ;;  %v1494_v26 = vmul.f32 %v1486_v14, %v1404_v7 }
 0x281   : > { %v1497_v27 = vadd.f32 %v1489_v15, %v1407_v62  ;;  %v1499_v28 = vadd.f32 %v1491_v16, %v1409_v19  ;;  %v1501_v56 = vadd.f32 %v1493_v17, %v1411_v8  ;;  %v1503_v29 = vadd.f32 %v1495_v18, %v1413_v9 }
 0x282   : > { %v1496_v30 = vadd.f32 %v1488_v20, %v1406_v10  ;;  %v1498_v4 = vadd.f32 %v1490_v22, %v1408_v21  ;;  %v1500_v31 = vadd.f32 %v1492_v25, %v1410_v23  ;;  %v1502_v32 = vadd.f32 %v1494_v26, %v1412_v24  ;;  %v1851_v22 = vld [vmem:[%s3782_s7 + $0x1f8] sm:$0xff] }
 0x283   : > { %v1505_v33 = vmul.f32 0.01, %v1497_v27  ;;  %v1507_v34 = vmul.f32 0.01, %v1499_v28  ;;  %v1509_v36 = vmul.f32 0.01, %v1501_v56  ;;  %v1538_v62 = vlaneseq }
 0x284   : > { %v1511_v37 = vmul.f32 0.01, %v1503_v29  ;;  %v1504_v39 = vmul.f32 0.01, %v1496_v30  ;;  %v1506_v38 = vmul.f32 0.01, %v1498_v4 }
 0x285   : > { %v1513_v35 = vmax.f32 %v1497_v27, %v1505_v33  ;;  %v1515_v40 = vmax.f32 %v1499_v28, %v1507_v34  ;;  %v1517_v41 = vmax.f32 %v1501_v56, %v1509_v36  ;;  %v1508_v42 = vmul.f32 0.01, %v1500_v31  ;;  %v1682_v34 = vld [vmem:[%s3780_s5] sm:$0xff] }
 0x286   : > { %v1519_v43 = vmax.f32 %v1503_v29, %v1511_v37  ;;  %v1510_v44 = vmul.f32 0.01, %v1502_v32  ;;  %v1512_v45 = vmax.f32 %v1496_v30, %v1504_v39  ;;  %v1514_v46 = vmax.f32 %v1498_v4, %v1506_v38 }
 0x287   : > { %v1521_v47 = vmax.f32 %v1513_v35, %v1515_v40  ;;  %v1516_v48 = vmax.f32 %v1500_v31, %v1508_v42  ;;  %v3391_v19 = vand.u32 127, %v1538_v62 }
 0x288   : > { %v1523_v49 = vmax.f32 %v1517_v41, %v1519_v43  ;;  %v1518_v50 = vmax.f32 %v1502_v32, %v1510_v44  ;;  %v1520_v51 = vmax.f32 %v1512_v45, %v1514_v46 }
 0x289   : > { %v1545_v0 = vand.u32 15, %v3391_v19  ;;  %v1540_v2 = vadd.s32 128, %v3391_v19 }
 0x28a   : > { %v1525_v52 = vmax.f32 %v1521_v47, %v1523_v49  ;;  %v1522_v53 = vmax.f32 %v1516_v48, %v1518_v50 }
 0x28b   : > { %vm3394_vm7 = vcmp.le.s32.totalorder %v1545_v0, 14  ;;  %v1552_v6 = vand.u32 15, %v1540_v2  ;;  %vm3407_vm11 = vcmp.ge.s32.totalorder %v1545_v0, 1 }
 0x28c   : > { %1531 = vrot.lane.b32.xlu2 %v1525_v52, %s2824_s1  ;;  %v1524_v54 = vmax.f32 %v1520_v51, %v1522_v53  ;;  %v1526_v52 = vld [vmem:[%s3779_s4] sm:$0xff] }
 0x28d   : > { %vm3401_vm8 = vcmp.le.s32.totalorder %v1552_v6, 14  ;;  %vm3416_vm13 = vcmp.ge.s32.totalorder %v1552_v6, 1 }
 0x28e   : > { %1529 = vrot.lane.b32.xlu1 %v1524_v54, %s2824_s1  ;;  %s3811_s1 = smov 119  }
 0x2e6   : > { %v1532_v55 = vpop.permute.xlu2 %1531 }
 0x2e7   : > { %v1537_v57 = vsel %vm1161_vm1, %v1532_v55, 0.0 }
 0x2e8   : > { %1675 = vrot.lane.b32.xlu1 %v1537_v57, %s2825_s24 }
 0x300   : > { %v1530_v58 = vpop.permute.xlu1 %1529 }
 0x301   : > { %v1533_v59 = vsel %vm1161_vm1, %v1530_v58, %v1532_v55  ;;  %v1536_v60 = vsel %vm1161_vm1, 0.0, %v1530_v58  ;;  %vm1590_vm1 = vcmask 973824  }
 0x302   : > { %1636 = vrot.lane.b32.xlu2 %v1536_v60, %s2826_s19  ;;  %1612 = vrot.lane.b32.xlu0 %v1533_v59, %s2827_s20  ;;  %v2775_v61 = vpack.i.bf16 %v1533_v59, %v1536_v60 }
 0x303   : > { %1625 = vrot.lane.b32.xlu1 %v1533_v59, %s2828_s26 }
 0x30a   : > { %1599 = vrot.lane.b32.xlu0 %v1533_v59, %s2829_s27  ;;  %1638 = vrot.lane.b32.xlu2 %v1533_v59, %s2826_s19 }
 0x30b   : > { %1610 = vrot.lane.b32.xlu1 %v1536_v60, %s2827_s20 }
 0x312   : > { %1586 = vrot.lane.b32.xlu0 %v1533_v59, %s3792_s29  ;;  %1640 = vrot.lane.b32.xlu2 %v1537_v57, %s2826_s19  ;;  %s3809_s19 = smov 121  }
 0x313   : > { %2776 = vrot.lane.b32.xlu1 %v2775_v61, %s3793_s30 }
 0x31a   : > { %1653 = vrot.lane.b32.xlu0 %v1537_v57, %s3795_s21  ;;  %2771 = vrot.lane.b32.xlu2 %v2775_v61, %s2825_s24 }
 0x31b   : > { %1597 = vrot.lane.b32.xlu1 %v1536_v60, %s2829_s27 }
 0x322   : > { %1573 = vrot.lane.b32.xlu0 %v1537_v57, %s3794_s0  ;;  %1623 = vrot.lane.b32.xlu2 %v1536_v60, %s2828_s26 }
 0x323   : > { %1584 = vrot.lane.b32.xlu1 %v1536_v60, %s3792_s29 }
 0x32a   : > { %1627 = vrot.lane.b32.xlu2 %v1537_v57, %s2828_s26  ;;  %s3810_s26 = smov 104  }
 0x32b   : > { %2781 = vrot.lane.b32.xlu1 %v2775_v61, %s3795_s21  ;;  %s2837_s21 = smov 111  }
 0x332   : > { %1614 = vrot.lane.b32.xlu2 %v1537_v57, %s2827_s20 }
 0x333   : > { %1571 = vrot.lane.b32.xlu1 %v1533_v59, %s3794_s0 }
 0x33a   : > { %1664 = vrot.lane.b32.xlu2 %v1537_v57, %s3793_s30  ;;  %s2836_s30 = smov 16  }
 0x342   : > { %1601 = vrot.lane.b32.xlu2 %v1537_v57, %s2829_s27 }
 0x34a   : > { %1588 = vrot.lane.b32.xlu2 %v1537_v57, %s3792_s29  ;;  %s2835_s29 = smov 64  }
 0x352   : > { %1569 = vrot.lane.b32.xlu2 %v1536_v60, %s3794_s0  ;;  %s3808_s0 = smov 120  }
 0x35a   : > { %v1676_v9 = vpop.permute.xlu1 %1675  ;;  %1685 = vperm.xlu2 %2785, %v1682_v34   ;;  %v1845_v34 = vld [vmem:[%s3782_s7 + $0x1c8] sm:$0xff] }
 0x35c   : > { %v1637_v63 = vpop.permute.xlu2 %1636 }
 0x364   : > { %v1639_v3 = vpop.permute.xlu2 %1638 }
 0x365   : > { %v1643_v5 = vsel %vm1642_vm6, %v1637_v63, %v1639_v3  ;;  %v2834_v63 = vmov 2048.0  }
 0x366   : > { %2621 = vmatpush.msk.msrb.mxu2 %vm3394_vm7, %v1643_v5  ;;  %2790 = vrcp.f32 %v2834_v63  ;;  %v1830_v63 = vld [vmem:[%s3782_s7 + $0x150] sm:$0xff] }
 0x36c   : > { %v1641_v8 = vpop.permute.xlu2 %1640  ;;  %v2791_v0 = vpop.eup %2790 }
 0x36d   : > { %v1644_v10 = vsel %vm1642_vm6, %v1639_v3, %v1641_v8  ;;  %v1746_v1 = vmul.f32 2048.0, %v2791_v0  ;;  %vm1750_vm5 = vweird.f32 %v2791_v0 }
 0x36e   : > { %2628 = vmatpush.msk.msra.mxu3 %vm3401_vm8, %v1644_v10 }
 0x36f   : > { %v1747_v2 = vsub.f32 1.0, %v1746_v1  ;;  %v1831_v1 = vld [vmem:[%s3782_s7 + $0x158] sm:$0xff] }
 0x371   : > { %v1748_v6 = vmul.f32 %v2791_v0, %v1747_v2  ;;  %v1796_v2 = vld [vmem:[%s3782_s7 + $0x40] sm:$0xff] }
 0x374   : > { %v2772_v11 = vpop.permute.xlu2 %2771  ;;  %v1613_v24 = vpop.permute.xlu0 %1612 }
 0x375   : > { %v2774_v12 = vunpack.i.h.bf16 %v2772_v11  ;;  %v2773_v13 = vunpack.i.l.bf16 %v2772_v11  ;;  %v1626_v14 = vpop.permute.xlu1 %1625 }
 0x377   : > { %v1678_v15 = vsel %vm1677_vm9, %v2773_v13, %v2774_v12  ;;  %v1679_v16 = vsel %vm1677_vm9, %v2774_v12, %v1676_v9  ;;  %v1749_v9 = vadd.f32 %v2791_v0, %v1748_v6  ;;  %v1797_v6 = vld [vmem:[%s3782_s7 + $0x48] sm:$0xff]  ;;  %vm1948_vm9 = vcmask 130048  }
 0x378   : > { %1700 = vmatpush.msrb.mxu2 %v1678_v15  ;;  %1720 = vmatpush.msra.mxu3 %v1679_v16 }
 0x379   : > { %v3451_v12 = vsel %vm1750_vm5, %v2791_v0, %v1749_v9  ;;  %v1799_v0 = vld [vmem:[%s3782_s7 + $0x58] sm:$0xff]  ;;  %v1826_v9 = vld [vmem:[%s3782_s7 + $0x130] sm:$0xff] }
 0x37c   : > { %v1624_v18 = vpop.permute.xlu2 %1623  ;;  %v1600_v30 = vpop.permute.xlu0 %1599 }
 0x37d   : > { %v1630_v21 = vsel %vm1629_vm10, %v1624_v18, %v1626_v14  ;;  %v1611_v23 = vpop.permute.xlu1 %1610 }
 0x37e   : > { %2622 = vmatpush.msk.msrb.mxu2 %vm3407_vm11, %v1630_v21  ;;  %v1617_v20 = vsel %vm1616_vm12, %v1611_v23, %v1613_v24  ;;  %v1818_v23 = vld [vmem:[%s3782_s7 + $0xf0] sm:$0xff] }
 0x37f   : > { %1852 = vmatpush.msra.mxu0 %v1818_v23  ;;  %v1825_v23 = vld [vmem:[%s3782_s7 + $0x128] sm:$0xff] }
 0x380   : > { %2623 = vmatpush.msk.msrb.mxu2 %vm3394_vm7, %v1617_v20  ;;  %v1819_v20 = vld [vmem:[%s3782_s7 + $0xf8] sm:$0xff] }
 0x381   : > { %1892 = vmatpush.msrb.mxu1 %v1819_v20  ;;  %v1822_v20 = vld [vmem:[%s3782_s7 + $0x110] sm:$0xff] }
 0x384   : > { %v1628_v25 = vpop.permute.xlu2 %1627  ;;  %v1587_v36 = vpop.permute.xlu0 %1586 }
 0x385   : > { %v1631_v26 = vsel %vm1629_vm10, %v1626_v14, %v1628_v25  ;;  %v2777_v27 = vpop.permute.xlu1 %2776  ;;  %v1816_v25 = vld [vmem:[%s3782_s7 + $0xe0] sm:$0xff]  ;;  %vm1950_vm10 = vcmask 654336  }
 0x386   : > { %v2779_v28 = vunpack.i.h.bf16 %v2777_v27  ;;  %v2778_v56 = vunpack.i.l.bf16 %v2777_v27  ;;  %2629 = vmatpush.msk.msra.mxu3 %vm3416_vm13, %v1631_v26  ;;  %v1848_v26 = vld [vmem:[%s3782_s7 + $0x1e0] sm:$0xff]  ;;  %v1817_v27 = vld [vmem:[%s3782_s7 + $0xe8] sm:$0xff]  ;;  %1853 = vmatpush.msra.mxu0 %v1816_v25  ;;  %v1791_v25 = vld [vmem:[%s3782_s7 + $0x18] sm:$0xff] }
 0x387   : > { %1893 = vmatpush.msrb.mxu1 %v1817_v27  ;;  %v1788_v27 = vld [vmem:[%s3782_s7] sm:$0xff] }
 0x388   : > { %v1667_v29 = vsel %vm1666_vm14, %v2778_v56, %v2779_v28  ;;  %v1814_v56 = vld [vmem:[%s3782_s7 + $0xd0] sm:$0xff] }
 0x389   : > { %1703 = vmatpush.msrb.mxu2 %v1667_v29  ;;  %v1846_v29 = vld [vmem:[%s3782_s7 + $0x1d0] sm:$0xff]  ;;  %1854 = vmatpush.msra.mxu0 %v1814_v56 }
 0x38c   : > { %v1615_v4 = vpop.permute.xlu2 %1614  ;;  %v1654_v43 = vpop.permute.xlu0 %1653 }
 0x38d   : > { %v1618_v31 = vsel %vm1616_vm12, %v1613_v24, %v1615_v4  ;;  %v1598_v32 = vpop.permute.xlu1 %1597  ;;  %v1850_v24 = vld [vmem:[%s3782_s7 + $0x1f0] sm:$0xff]  ;;  %v1847_v4 = vld [vmem:[%s3782_s7 + $0x1d8] sm:$0xff] }
 0x38e   : > { %v1604_v33 = vsel %vm1603_vm15, %v1598_v32, %v1600_v30  ;;  %2630 = vmatpush.msk.msra.mxu3 %vm3401_vm8, %v1618_v31  ;;  %v1812_v31 = vld [vmem:[%s3782_s7 + $0xc0] sm:$0xff] }
 0x38f   : > { %2624 = vmatpush.msk.msrb.mxu2 %vm3407_vm11, %v1604_v33  ;;  %v1844_v32 = vld [vmem:[%s3782_s7 + $0x1c0] sm:$0xff]  ;;  %v1813_v33 = vld [vmem:[%s3782_s7 + $0xc8] sm:$0xff]  ;;  %1855 = vmatpush.msra.mxu0 %v1812_v31 }
 0x394   : > { %v1665_v37 = vpop.permute.xlu2 %1664  ;;  %v1574_v51 = vpop.permute.xlu0 %1573 }
 0x395   : > { %v1585_v39 = vpop.permute.xlu1 %1584  ;;  %v1668_v38 = vsel %vm1666_vm14, %v2779_v28, %v1665_v37  ;;  %v1849_v28 = vld [vmem:[%s3782_s7 + $0x1e8] sm:$0xff]  ;;  %v1842_v37 = vld [vmem:[%s3782_s7 + $0x1b0] sm:$0xff] }
 0x396   : > { %v1591_v35 = vsel %vm1590_vm1, %v1585_v39, %v1587_v36  ;;  %1723 = vmatpush.msra.mxu3 %v1668_v38  ;;  %v1811_v39 = vld [vmem:[%s3782_s7 + $0xb8] sm:$0xff] }
 0x397   : > { %2625 = vmatpush.msk.msrb.mxu2 %vm3394_vm7, %v1591_v35  ;;  %v1843_v38 = vld [vmem:[%s3782_s7 + $0x1b8] sm:$0xff]  ;;  %v1808_v35 = vld [vmem:[%s3782_s7 + $0xa0] sm:$0xff] }
 0x39c   : > { %v1602_v40 = vpop.permute.xlu2 %1601 }
 0x39d   : > { %v1605_v41 = vsel %vm1603_vm15, %v1600_v30, %v1602_v40  ;;  %v2782_v42 = vpop.permute.xlu1 %2781  ;;  %v1815_v30 = vld [vmem:[%s3782_s7 + $0xd8] sm:$0xff]  ;;  %v1840_v40 = vld [vmem:[%s3782_s7 + $0x1a0] sm:$0xff] }
 0x39e   : > { %v2784_v44 = vunpack.i.h.bf16 %v2782_v42  ;;  %v2783_v45 = vunpack.i.l.bf16 %v2782_v42  ;;  %2631 = vmatpush.msk.msra.mxu3 %vm3416_vm13, %v1605_v41  ;;  %1894 = vmatpush.msrb.mxu1 %v1815_v30  ;;  %v1809_v41 = vld [vmem:[%s3782_s7 + $0xa8] sm:$0xff] }
 0x39f   : > { %v1841_v42 = vld [vmem:[%s3782_s7 + $0x1a8] sm:$0xff] }
 0x3a0   : > { %v1656_v46 = vsel %vm1655_vm2, %v2783_v45, %v2784_v44  ;;  %v1657_v50 = vsel %vm1655_vm2, %v2784_v44, %v1654_v43  ;;  %1895 = vmatpush.msrb.mxu1 %v1813_v33  ;;  %v1806_v43 = vld [vmem:[%s3782_s7 + $0x90] sm:$0xff]  ;;  %v1807_v45 = vld [vmem:[%s3782_s7 + $0x98] sm:$0xff]  ;;  %v1821_v30 = vld [vmem:[%s3782_s7 + $0x108] sm:$0xff]  ;;  %vm2089_vm2 = vcmask 523264  }
 0x3a1   : > { %1706 = vmatpush.msrb.mxu2 %v1656_v46  ;;  %v1838_v44 = vld [vmem:[%s3782_s7 + $0x190] sm:$0xff]  ;;  %v1839_v46 = vld [vmem:[%s3782_s7 + $0x198] sm:$0xff] }
 0x3a2   : > { %1896 = vmatpush.msrb.mxu1 %v1811_v39 }
 0x3a4   : > { %v1589_v47 = vpop.permute.xlu2 %1588  ;;  %1897 = vmatpush.msrb.mxu1 %v1809_v41 }
 0x3a5   : > { %v1592_v48 = vsel %vm1590_vm1, %v1587_v36, %v1589_v47  ;;  %v1572_v49 = vpop.permute.xlu1 %1571  ;;  %v1810_v36 = vld [vmem:[%s3782_s7 + $0xb0] sm:$0xff]  ;;  %v1804_v47 = vld [vmem:[%s3782_s7 + $0x80] sm:$0xff] }
 0x3a6   : > { %2632 = vmatpush.msk.msra.mxu3 %vm3401_vm8, %v1592_v48  ;;  %v1577_v53 = vsel %vm1575_vm3, %v1572_v49, %v1574_v51  ;;  %1856 = vmatpush.msra.mxu0 %v1810_v36  ;;  %v1836_v48 = vld [vmem:[%s3782_s7 + $0x180] sm:$0xff]  ;;  %v1802_v51 = vld [vmem:[%s3782_s7 + $0x70] sm:$0xff] }
 0x3a7   : > { %1898 = vmatpush.msrb.mxu1 %v1807_v45 }
 0x3a8   : > { %1726 = vmatpush.msra.mxu3 %v1657_v50  ;;  %1857 = vmatpush.msra.mxu0 %v1808_v35  ;;  %v1837_v50 = vld [vmem:[%s3782_s7 + $0x188] sm:$0xff] }
 0x3a9   : > { %v1733_v35 = vld [vmem:[%s3781_s6 + $0x8] sm:$0xff] }
 0x3aa   : > { %2633 = vmatpush.msk.msra.mxu3 %vm3416_vm13, %v1577_v53  ;;  %1858 = vmatpush.msra.mxu0 %v1806_v43  ;;  %v1803_v53 = vld [vmem:[%s3782_s7 + $0x78] sm:$0xff]  ;;  %vm2030_vm13 = vcmask 519168  }
 0x3ab   : > { %2634 = vmatmul.msk.f32.vlgmr.msra.gmra.mxu3 %vm1688_vm4, %v1526_v52  ;;  %v1735_v43 = vld [vmem:[%s3781_s6 + $0x18] sm:$0xff] }
 0x3ac   : > { %v1570_v54 = vpop.permute.xlu2 %1569  ;;  %1912 = vmatpush.msrb.mxu3 %v1851_v22  ;;  %1859 = vmatpush.msra.mxu0 %v1804_v47 }
 0x3ad   : > { %v1576_v55 = vsel %vm1575_vm3, %v1570_v54, %v1572_v49  ;;  %v1805_v49 = vld [vmem:[%s3782_s7 + $0x88] sm:$0xff]  ;;  %v1835_v54 = vld [vmem:[%s3782_s7 + $0x178] sm:$0xff] }
 0x3ae   : > { %2626 = vmatpush.msk.msrb.mxu2 %vm3407_vm11, %v1576_v55  ;;  %1913 = vmatpush.msrb.mxu3 %v1849_v28  ;;  %v1820_v28 = vld [vmem:[%s3782_s7 + $0x100] sm:$0xff] }
 0x3af   : > { %2627 = vmatmul.msk.f32.vlgmr.msrb.gmra.mxu2 %vm1688_vm4, %v1526_v52  ;;  %1899 = vmatpush.msrb.mxu1 %v1805_v49  ;;  %v1834_v52 = vld [vmem:[%s3782_s7 + $0x170] sm:$0xff] }
 0x3b0   : > { %1872 = vmatpush.msra.mxu2 %v1850_v24  ;;  %1914 = vmatpush.msrb.mxu3 %v1847_v4  ;;  %v1790_v24 = vld [vmem:[%s3782_s7 + $0x10] sm:$0xff] }
 0x3b1   : > { %1860 = vmatpush.msra.mxu0 %v1802_v51  ;;  %1900 = vmatpush.msrb.mxu1 %v1803_v53 }
 0x3b2   : > { %1873 = vmatpush.msra.mxu2 %v1848_v26  ;;  %1915 = vmatpush.msrb.mxu3 %v1845_v34  ;;  %v1823_v26 = vld [vmem:[%s3782_s7 + $0x118] sm:$0xff] }
 0x3b4   : > { %v1686_v57 = vpop.permute.xlu2 %1685  ;;  %1874 = vmatpush.msra.mxu2 %v1846_v29  ;;  %1916 = vmatpush.msrb.mxu3 %v1843_v38  ;;  %v1789_v29 = vld [vmem:[%s3782_s7 + $0x8] sm:$0xff]  ;;  %v1732_v38 = vld [vmem:[%s3781_s6] sm:$0xff] }
 0x3b6   : > { %1875 = vmatpush.msra.mxu2 %v1844_v32  ;;  %1917 = vmatpush.msrb.mxu3 %v1841_v42  ;;  %v1734_v42 = vld [vmem:[%s3781_s6 + $0x10] sm:$0xff] }
 0x3b8   : > { %1876 = vmatpush.msra.mxu2 %v1842_v37  ;;  %1918 = vmatpush.msrb.mxu3 %v1839_v46 }
 0x3ba   : > { %1877 = vmatpush.msra.mxu2 %v1840_v40  ;;  %1919 = vmatpush.msrb.mxu3 %v1837_v50 }
 0x3bc   : > { %1878 = vmatpush.msra.mxu2 %v1838_v44  ;;  %1920 = vmatpush.msrb.mxu3 %v1835_v54 }
 0x3be   : > { %1879 = vmatpush.msra.mxu2 %v1836_v48 }
 0x3c0   : > { %1880 = vmatpush.msra.mxu2 %v1834_v52 }
 0x42e   : > { %v1729_v58 = vpop.f32.mrf.mxu3 }
 0x42f   : > { %v1730_v59 = vadd.f32 %v1729_v58, %v1686_v57  ;;  %v1832_v58 = vld [vmem:[%s3782_s7 + $0x160] sm:$0xff] }
 0x430   : > { %1881 = vmatpush.msra.mxu2 %v1832_v58 }
 0x432   : > { %v1709_v60 = vpop.f32.mrf.mxu2  ;;  %1882 = vmatpush.msra.mxu2 %v1830_v63 }
 0x433   : > { %v1710_v61 = vadd.f32 %v1709_v60, %v1686_v57  ;;  %v1800_v57 = vld [vmem:[%s3782_s7 + $0x60] sm:$0xff] }
 0x434   : > { %1861 = vmatpush.msra.mxu0 %v1800_v57 }
 0x435   : > { %v1736_v62 = vadd.f32 %v1730_v59, %v1710_v61 }
 0x437   : > { %1737 = vadd.xlane.f32.xlu1 %v1736_v62  ;;  %v1798_v62 = vld [vmem:[%s3782_s7 + $0x50] sm:$0xff] }
 0x438   : > { %1862 = vmatpush.msra.mxu0 %v1798_v62 }
 0x43a   : > { %1863 = vmatpush.msra.mxu0 %v1796_v2  ;;  %v1956_v2 = vand.u32 7, %v3391_v19  ;;  %v1943_v19 = vld [vmem:[%s3783_s8] sm:$0xf] }
 0x43c   : > { %vm1970_vm11 = vcmp.le.s32.totalorder %v1956_v2, 6  ;;  %vm1964_vm12 = vcmp.ge.s32.totalorder %v1956_v2, 1 }
 0x4aa   : > { %v1738_v3 = vpop.xlane.xlu1 %1737 }
 0x4ab   : > { %v1739_v5 = vrot.slane %v1738_v3, 4 }
 0x4ad   : > { %v1740_v7 = vadd.f32 %v1739_v5, %v1738_v3  ;;  %v1828_v5 = vld [vmem:[%s3782_s7 + $0x140] sm:$0xff] }
 0x4ae   : > { %1883 = vmatpush.msra.mxu2 %v1828_v5 }
 0x4af   : > { %v1741_v8 = vrot.slane %v1740_v7, 2 }
 0x4b0   : > { %1884 = vmatpush.msra.mxu2 %v1826_v9 }
 0x4b1   : > { %v1742_v10 = vadd.f32 %v1741_v8, %v1740_v7  ;;  %v1829_v7 = vld [vmem:[%s3782_s7 + $0x148] sm:$0xff]  ;;  %v1794_v8 = vld [vmem:[%s3782_s7 + $0x30] sm:$0xff] }
 0x4b2   : > { %1864 = vmatpush.msra.mxu0 %v1794_v8 }
 0x4b3   : > { %v1743_v11 = vrot.slane %v1742_v10, 1 }
 0x4b5   : > { %v1744_v13 = vadd.f32 %v1743_v11, %v1742_v10  ;;  %v1795_v11 = vld [vmem:[%s3782_s7 + $0x38] sm:$0xff] }
 0x4b7   : > { %v1752_v14 = vmul.f32 %v3451_v12, %v1744_v13  ;;  %v1827_v13 = vld [vmem:[%s3782_s7 + $0x138] sm:$0xff] }
 0x4b9   : > { %v3454_v15 = vsub.f32 %v1710_v61, %v1752_v14  ;;  %v3456_v16 = vsub.f32 %v1730_v59, %v1752_v14  ;;  %v1801_v59 = vld [vmem:[%s3782_s7 + $0x68] sm:$0xff]  ;;  %v1792_v14 = vld [vmem:[%s3782_s7 + $0x20] sm:$0xff] }
 0x4ba   : > { %v1833_v61 = vld [vmem:[%s3782_s7 + $0x168] sm:$0xff]  ;;  %1901 = vmatpush.msrb.mxu1 %v1801_v59  ;;  %1865 = vmatpush.msra.mxu0 %v1792_v14 }
 0x4bb   : > { %v1755_v17 = vmul.f32 %v3454_v15, %v3454_v15  ;;  %v1756_v18 = vmul.f32 %v3456_v16, %v3456_v16  ;;  %1921 = vmatpush.msrb.mxu3 %v1833_v61 }
 0x4bc   : > { %1902 = vmatpush.msrb.mxu1 %v1799_v0  ;;  %1866 = vmatpush.msra.mxu0 %v1790_v24 }
 0x4bd   : > { %v1757_v21 = vadd.f32 %v1756_v18, %v1755_v17  ;;  %1922 = vmatpush.msrb.mxu3 %v1831_v1  ;;  %v1824_v17 = vld [vmem:[%s3782_s7 + $0x120] sm:$0xff] }
 0x4be   : > { %1903 = vmatpush.msrb.mxu1 %v1797_v6  ;;  %1885 = vmatpush.msra.mxu2 %v1824_v17  ;;  %v2000_v1 = vld [vmem:[%s3784_s9] sm:$0xf] }
 0x4bf   : > { %1758 = vadd.xlane.f32.xlu0 %v1757_v21  ;;  %1923 = vmatpush.msrb.mxu3 %v1829_v7  ;;  %v1793_v21 = vld [vmem:[%s3782_s7 + $0x28] sm:$0xff] }
 0x4c0   : > { %1904 = vmatpush.msrb.mxu1 %v1795_v11  ;;  %1886 = vmatpush.msra.mxu2 %v1822_v20 }
 0x4c1   : > { %1924 = vmatpush.msrb.mxu3 %v1827_v13  ;;  %1867 = vmatpush.msra.mxu0 %v1788_v27 }
 0x4c2   : > { %1905 = vmatpush.msrb.mxu1 %v1793_v21  ;;  %1887 = vmatpush.msra.mxu2 %v1820_v28 }
 0x4c3   : > { %1925 = vmatpush.msrb.mxu3 %v1825_v23  ;;  %v2840_v23 = vmov 256.0  }
 0x4c4   : > { %1906 = vmatpush.msrb.mxu1 %v1791_v25 }
 0x4c5   : > { %1926 = vmatpush.msrb.mxu3 %v1823_v26 }
 0x4c6   : > { %1907 = vmatpush.msrb.mxu1 %v1789_v29 }
 0x4c7   : > { %1927 = vmatpush.msrb.mxu3 %v1821_v30 }
 0x532   : > { %v1759_v55 = vpop.xlane.xlu0 %1758 }
 0x533   : > { %v1760_v60 = vrot.slane %v1759_v55, 4 }
 0x535   : > { %v1761_v3 = vadd.f32 %v1760_v60, %v1759_v55 }
 0x537   : > { %v1762_v10 = vrot.slane %v1761_v3, 2 }
 0x539   : > { %v1763_v18 = vadd.f32 %v1762_v10, %v1761_v3 }
 0x53b   : > { %v1764_v22 = vrot.slane %v1763_v18, 1 }
 0x53d   : > { %v1765_v56 = vadd.f32 %v1764_v22, %v1763_v18 }
 0x53f   : > { %v1766_v4 = vmul.f32 %v1765_v56, %v3451_v12 }
 0x541   : > { %v1767_v31 = vadd.f32 1e-05, %v1766_v4 }
 0x543   : > { %2792 = vrsqrt.f32 %v1767_v31  ;;  %vm1774_vm7 = vweird.f32 %v1767_v31 }
 0x544   : > { %2794 = vrcp.f32 %v2840_v23 }
 0x549   : > { %v2793_v32 = vpop.eup %2792 }
 0x54a   : > { %v1769_v33 = vmul.f32 %v2793_v32, %v1767_v31  ;;  %vm1775_vm6 = vweird.f32 %v2793_v32  ;;  %v2795_v24 = vpop.eup %2794 }
 0x54b   : > { %vm1776_vm8 = vmor %vm1774_vm7, %vm1775_vm6  ;;  %v2042_v20 = vmul.f32 256.0, %v2795_v24  ;;  %vm2046_vm14 = vweird.f32 %v2795_v24 }
 0x54c   : > { %v1770_v34 = vmul.f32 %v2793_v32, %v1769_v33 }
 0x54d   : > { %v2043_v22 = vsub.f32 1.0, %v2042_v20 }
 0x54e   : > { %v1771_v36 = vmul.f32 0.5, %v1770_v34 }
 0x54f   : > { %v2044_v28 = vmul.f32 %v2795_v24, %v2043_v22  ;;  %v2231_v22 = vld [vmem:[%s3789_s14 + $0x8] sm:$0xff] }
 0x550   : > { %v1772_v37 = vsub.f32 1.5, %v1771_v36 }
 0x551   : > { %v2045_v30 = vadd.f32 %v2795_v24, %v2044_v28 }
 0x552   : > { %v1773_v39 = vmul.f32 %v2793_v32, %v1772_v37 }
 0x554   : > { %v1777_v12 = vsel %vm1776_vm8, %v2793_v32, %v1773_v39  ;;  %v2047_v32 = vsel %vm2046_vm14, %v2795_v24, %v2045_v30 }
 0x555   : > { %v1778_v40 = vmul.f32 %v1777_v12, %v3454_v15  ;;  %v1779_v41 = vmul.f32 %v1777_v12, %v3456_v16 }
 0x557   : > { %v1780_v44 = vmul.f32 %v1778_v40, %v1732_v38  ;;  %v1781_v45 = vmul.f32 %v1779_v41, %v1733_v35  ;;  %v2088_v38 = vld [vmem:[%s3786_s11 + $0x38] sm:$0xff]  ;;  %v2087_v35 = vld [vmem:[%s3786_s11 + $0x30] sm:$0xff] }
 0x558   : > { %2101 = vmatpush.msrb.mxu2 %v2088_v38 }
 0x559   : > { %v1782_v46 = vadd.f32 %v1780_v44, %v1734_v42  ;;  %v1783_v47 = vadd.f32 %v1781_v45, %v1735_v43  ;;  %v2086_v42 = vld [vmem:[%s3786_s11 + $0x28] sm:$0xff]  ;;  %v2085_v44 = vld [vmem:[%s3786_s11 + $0x20] sm:$0xff]  ;;  %v2084_v45 = vld [vmem:[%s3786_s11 + $0x18] sm:$0xff] }
 0x55a   : > { %2102 = vmatpush.msrb.mxu2 %v2087_v35 }
 0x55b   : > { %v1784_v48 = vmul.f32 0.01, %v1782_v46  ;;  %v1785_v49 = vmul.f32 0.01, %v1783_v47 }
 0x55c   : > { %2103 = vmatpush.msrb.mxu2 %v2086_v42 }
 0x55d   : > { %v1786_v50 = vmax.f32 %v1782_v46, %v1784_v48  ;;  %v1787_v51 = vmax.f32 %v1783_v47, %v1785_v49  ;;  %v2083_v47 = vld [vmem:[%s3786_s11 + $0x10] sm:$0xff]  ;;  %v2082_v49 = vld [vmem:[%s3786_s11 + $0x8] sm:$0xff] }
 0x55e   : > { %2104 = vmatpush.msrb.mxu2 %v2085_v44 }
 0x55f   : > { %1868 = vmatmul.f32.vlgmr.msra.gmra.mxu0 %v1786_v50  ;;  %1888 = vmatmul.f32.vlgmr.msra.gmra.mxu2 %v1787_v51 }
 0x560   : > { %1908 = vmatmul.f32.vlgmr.msrb.gmra.mxu1 %v1786_v50  ;;  %1928 = vmatmul.f32.vlgmr.msrb.gmra.mxu3 %v1787_v51  ;;  %v2081_v51 = vld [vmem:[%s3786_s11] sm:$0xff] }
 0x561   : > { %2105 = vmatpush.msrb.mxu2 %v2084_v45 }
 0x563   : > { %2106 = vmatpush.msrb.mxu2 %v2083_v47 }
 0x565   : > { %2107 = vmatpush.msrb.mxu2 %v2082_v49 }
 0x567   : > { %2108 = vmatpush.msrb.mxu2 %v2081_v51 }
 0x569   : > { %2250 = vmatpush.msra.mxu2 %v2231_v22 }
 0x5dc   : > { %v1869_v15 = vpop.f32.mrf.mxu0 }
 0x5dd   : > { %v1909_v54 = vpop.f32.mrf.mxu1 }
 0x5e2   : > { %v1889_v16 = vpop.f32.mrf.mxu2 }
 0x5e3   : > { %v1890_v52 = vadd.f32 %v1889_v16, %v1869_v15  ;;  %v1929_v53 = vpop.f32.mrf.mxu3 }
 0x5e4   : > { %v1930_v55 = vadd.f32 %v1929_v53, %v1909_v54 }
 0x5e5   : > { %1933 = vrot.lane.b32.xlu2 %v1890_v52, %s2835_s29 }
 0x5ed   : > { %1938 = vrot.lane.b32.xlu2 %v1930_v55, %s2835_s29 }
 0x63f   : > { %v1934_v57 = vpop.permute.xlu2 %1933 }
 0x640   : > { %v1936_v59 = vmax.f32 %v1890_v52, %v1934_v57 }
 0x647   : > { %v1939_v58 = vpop.permute.xlu2 %1938 }
 0x648   : > { %v1941_v60 = vmax.f32 %v1930_v55, %v1939_v58 }
 0x64a   : > { %v1942_v61 = vmax.f32 %v1936_v59, %v1941_v60  ;;  %v2029_v60 = vld [vmem:[%s3785_s10] sm:$0xff] }
 0x64c   : > { %1945 = vrot.lane.b32.xlu2 %v1942_v61, %s2836_s30  ;;  %s2841_s30 = smov 96  }
 0x6a6   : > { %v1946_v62 = vpop.permute.xlu2 %1945 }
 0x6a7   : > { %v1949_v63 = vsel %vm1948_vm9, 0.0, %v1946_v62 }
 0x6a8   : > { %v1951_v0 = vsel %vm1950_vm10, %v1949_v63, 0.0  ;;  %v2076_v63 = vrot.slane %v2029_v60, 4 }
 0x6a9   : > { %1979 = vrot.lane.b32.xlu0 %v1951_v0, %s2837_s21  ;;  %1983 = vrot.lane.b32.xlu1 %v1951_v0, %s2829_s27 }
 0x6aa   : > { %1987 = vrot.lane.b32.xlu2 %v1951_v0, %s2827_s20 }
 0x6b1   : > { %1991 = vrot.lane.b32.xlu0 %v1951_v0, %s3808_s0  ;;  %1966 = vrot.lane.b32.xlu1 %v1951_v0, %s3809_s19 }
 0x6b2   : > { %1997 = vrot.lane.b32.xlu2 %v1951_v0, %s3810_s26 }
 0x6ba   : > { %1994 = vrot.lane.b32.xlu2 %v1951_v0, %s2838_s17 }
 0x6c2   : > { %1975 = vrot.lane.b32.xlu2 %v1951_v0, %s2839_s18 }
 0x6ca   : > { %1971 = vrot.lane.b32.xlu2 %v1951_v0, %s3811_s1  ;;  %s3812_s1 = sadd.s32 4294967295, %s2820_s23  }
 0x6cb   : > { %p687_p8 = scmp.lt.s32.totalorder %s3812_s1, 1  ;;  %s3813_s24 = smov %s3812_s1 }
 0x6cd   : > { %s3818_s24 = smov (!%p687_p8, %s3813_s24), 1 }
 0x6ce   : > { %s2324_s27 = sshll.u32 %s3818_s24, 3 }
 0x6cf   : > { %s690_s0 = scalar_lea.vmem %s3791_s16, %s2324_s27 }
 0x6d2   : > { %2003 = vperm.xlu2 %2785, %v2000_v1  }
 0x704   : > { %v1988_v3 = vpop.permute.xlu2 %1987 }
 0x705   : > { %2635 = vmatpush.msk.msrb.mxu0 %vm1970_vm11, %v1988_v3 }
 0x70c   : > { %v1998_v5 = vpop.permute.xlu2 %1997 }
 0x70d   : > { %2017 = vmatpush.msrb.mxu0 %v1998_v5 }
 0x714   : > { %v1995_v6 = vpop.permute.xlu2 %1994 }
 0x71b   : > { %v1984_v7 = vpop.permute.xlu1 %1983  ;;  %v1980_v8 = vpop.permute.xlu0 %1979 }
 0x71c   : > { %v1976_v9 = vpop.permute.xlu2 %1975  ;;  %2636 = vmatpush.msk.msrb.mxu0 %vm1964_vm12, %v1984_v7  ;;  %v2126_v7 = vld [vmem:[%s3787_s12 + $0x18] sm:$0xff] }
 0x71d   : > { %2173 = vmatpush.msra.mxu3 %v2126_v7 }
 0x71e   : > { %2637 = vmatpush.msk.msrb.mxu0 %vm1970_vm11, %v1980_v8 }
 0x720   : > { %2020 = vmatpush.msrb.mxu0 %v1995_v6  ;;  %v2124_v6 = vld [vmem:[%s3787_s12 + $0x8] sm:$0xff] }
 0x721   : > { %2149 = vmatpush.msra.mxu1 %v2124_v6 }
 0x722   : > { %2638 = vmatpush.msk.msrb.mxu0 %vm1964_vm12, %v1976_v9 }
 0x723   : > { %v1992_v11 = vpop.permute.xlu0 %1991  ;;  %v1967_v13 = vpop.permute.xlu1 %1966 }
 0x724   : > { %v1972_v10 = vpop.permute.xlu2 %1971 }
 0x725   : > { %2639 = vmatpush.msk.msrb.mxu0 %vm1970_vm11, %v1972_v10  ;;  %v2123_v10 = vld [vmem:[%s3787_s12] sm:$0xff] }
 0x726   : > { %2150 = vmatpush.msra.mxu1 %v2123_v10 }
 0x727   : > { %2023 = vmatpush.msrb.mxu0 %v1992_v11  ;;  %v2130_v11 = vld [vmem:[%s3787_s12 + $0x38] sm:$0xff] }
 0x729   : > { %2640 = vmatpush.msk.msrb.mxu0 %vm1964_vm12, %v1967_v13  ;;  %v2129_v13 = vld [vmem:[%s3787_s12 + $0x30] sm:$0xff] }
 0x72a   : > { %2641 = vmatmul.msk.f32.vlgmr.msrb.gmra.mxu0 %vm1688_vm4, %v1943_v19  ;;  %v2125_v19 = vld [vmem:[%s3787_s12 + $0x10] sm:$0xff] }
 0x72b   : > { %2221 = vmatpush.msra.mxu0 %v2130_v11  ;;  %2174 = vmatpush.msra.mxu3 %v2125_v19 }
 0x72c   : > { %v2004_v14 = vpop.permute.xlu2 %2003 }
 0x72d   : > { %2222 = vmatpush.msra.mxu0 %v2129_v13 }
 0x7a7   : > { %v2026_v17 = vpop.f32.mrf.mxu0 }
 0x7a8   : > { %v2027_v18 = vadd.f32 %v2026_v17, %v2004_v14  ;;  %v2128_v14 = vld [vmem:[%s3787_s12 + $0x28] sm:$0xff]  ;;  %v2127_v17 = vld [vmem:[%s3787_s12 + $0x20] sm:$0xff] }
 0x7a9   : > { %2197 = vmatpush.msrb.mxu1 %v2128_v14 }
 0x7aa   : > { %v2031_v21 = vsel %vm2030_vm13, %v2027_v18, 0.0 }
 0x7ab   : > { %2032 = vadd.xlane.f32.xlu0 %v2031_v21  ;;  %2198 = vmatpush.msrb.mxu1 %v2127_v17 }
 0x81e   : > { %v2033_v25 = vpop.xlane.xlu0 %2032 }
 0x81f   : > { %v2034_v26 = vsel %vm1165_vm0, %v2033_v25, 0.0  ;;  %v2230_v25 = vld [vmem:[%s3789_s14] sm:$0xff] }
 0x820   : > { %v2035_v27 = vrot.slane %v2034_v26, 4  ;;  %2251 = vmatpush.msra.mxu2 %v2230_v25 }
 0x822   : > { %v2036_v56 = vadd.f32 %v2035_v27, %v2034_v26  ;;  %v2131_v27 = vld [vmem:[%s3788_s13] sm:$0x1] }
 0x824   : > { %v2037_v29 = vrot.slane %v2036_v56, 2 }
 0x826   : > { %v2038_v4 = vadd.f32 %v2037_v29, %v2036_v56 }
 0x828   : > { %v2039_v31 = vrot.slane %v2038_v4, 1 }
 0x82a   : > { %v2040_v33 = vadd.f32 %v2039_v31, %v2038_v4 }
 0x82c   : > { %v2048_v34 = vmul.f32 %v2047_v32, %v2040_v33 }
 0x82e   : > { %v2049_v36 = vsub.f32 %v2027_v18, %v2048_v34 }
 0x830   : > { %v2050_v37 = vmul.f32 %v2049_v36, %v2049_v36 }
 0x832   : > { %v2051_v39 = vsel %vm2030_vm13, %v2050_v37, 0.0 }
 0x833   : > { %2052 = vadd.xlane.f32.xlu1 %v2051_v39 }
 0x8a6   : > { %v2053_v12 = vpop.xlane.xlu1 %2052 }
 0x8a7   : > { %v2054_v40 = vsel %vm1165_vm0, %v2053_v12, 0.0 }
 0x8a8   : > { %v2055_v41 = vrot.slane %v2054_v40, 4 }
 0x8aa   : > { %v2056_v43 = vadd.f32 %v2055_v41, %v2054_v40 }
 0x8ac   : > { %v2057_v46 = vrot.slane %v2056_v43, 2 }
 0x8ae   : > { %v2058_v48 = vadd.f32 %v2057_v46, %v2056_v43 }
 0x8b0   : > { %v2059_v50 = vrot.slane %v2058_v48, 1 }
 0x8b2   : > { %v2060_v15 = vadd.f32 %v2059_v50, %v2058_v48 }
 0x8b4   : > { %v2061_v16 = vmul.f32 %v2060_v15, %v2047_v32 }
 0x8b6   : > { %v2062_v52 = vadd.f32 1e-05, %v2061_v16 }
 0x8b8   : > { %2796 = vrsqrt.f32 %v2062_v52  ;;  %vm2069_vm15 = vweird.f32 %v2062_v52 }
 0x8be   : > { %v2797_v53 = vpop.eup %2796 }
 0x8bf   : > { %v2064_v54 = vmul.f32 %v2797_v53, %v2062_v52  ;;  %vm2070_vm0 = vweird.f32 %v2797_v53 }
 0x8c0   : > { %vm2071_vm1 = vmor %vm2069_vm15, %vm2070_vm0 }
 0x8c1   : > { %v2065_v55 = vmul.f32 %v2797_v53, %v2064_v54 }
 0x8c3   : > { %v2066_v57 = vmul.f32 0.5, %v2065_v55 }
 0x8c5   : > { %v2067_v58 = vsub.f32 1.5, %v2066_v57 }
 0x8c7   : > { %v2068_v59 = vmul.f32 %v2797_v53, %v2067_v58 }
 0x8c9   : > { %v2072_v61 = vsel %vm2071_vm1, %v2797_v53, %v2068_v59 }
 0x8ca   : > { %v2073_v62 = vmul.f32 %v2072_v61, %v2049_v36  ;;  %v2232_v36 = vld [vmem:[%s3790_s15] sm:$0x1] }
 0x8cc   : > { %v2074_v0 = vmul.f32 %v2073_v62, %v2029_v60 }
 0x8ce   : > { %v2078_v1 = vadd.f32 %v2076_v63, %v2074_v0 }
 0x8d0   : > { %v2079_v2 = vmul.f32 0.01, %v2078_v1 }
 0x8d2   : > { %v2080_v3 = vmax.f32 %v2078_v1, %v2079_v2 }
 0x8d4   : > { %2642 = vmatmul.msk.f32.vlgmr.msrb.gmra.mxu2 %vm2089_vm2, %v2080_v3 }
 0x957   : > { %v2110_v5 = vpop.f32.mrf.mxu2 }
 0x958   : > { %2114 = vrot.lane.b32.xlu2 %v2110_v5, %s2838_s17 }
 0x9b2   : > { %v2115_v8 = vpop.permute.xlu2 %2114 }
 0x9b3   : > { %v2117_v9 = vmax.f32 %v2110_v5, %v2115_v8 }
 0x9b5   : > { %2119 = vrot.lane.b32.xlu2 %v2117_v9, %s2841_s30 }
 0xa0f   : > { %v2120_v18 = vpop.permute.xlu2 %2119 }
 0xa10   : > { %v2122_v21 = vmax.f32 %v2117_v9, %v2120_v18 }
 0xa12   : > { %v2156_v23 = vrot.slane %v2122_v21, 1  ;;  %v2204_v24 = vrot.slane %v2122_v21, 3  ;;  %2643 = vmatmul.msk.f32.vlgmr.msra.gmra.mxu1 %vm1948_vm9, %v2122_v21  ;;  %v2180_v20 = vrot.slane %v2122_v21, 2 }
 0xa14   : > { %2644 = vmatmul.msk.f32.vlgmr.msra.gmra.mxu3 %vm1948_vm9, %v2156_v23  ;;  %2646 = vmatmul.msk.f32.vlgmr.msra.gmra.mxu0 %vm1948_vm9, %v2204_v24 }
 0xa1a   : > { %2645 = vmatmul.msk.f32.vlgmr.msrb.gmra.mxu1 %vm1948_vm9, %v2180_v20 }
 0xa8f   : > { %v2152_v26 = vpop.f32.mrf.mxu1 }
 0xa90   : > { %v2155_v28 = vadd.f32 %v2152_v26, %v2131_v27 }
 0xa91   : > { %v2224_v31 = vpop.f32.mrf.mxu0 }
 0xa97   : > { %v2176_v56 = vpop.f32.mrf.mxu3  ;;  %v2200_v30 = vpop.f32.mrf.mxu1 }
 0xa98   : > { %v2179_v29 = vadd.f32 %v2176_v56, %v2155_v28 }
 0xa9a   : > { %v2203_v4 = vadd.f32 %v2200_v30, %v2179_v29 }
 0xa9c   : > { %v2227_v32 = vadd.f32 %v2224_v31, %v2203_v4 }
 0xa9e   : > { %v2228_v33 = vmul.f32 0.01, %v2227_v32 }
 0xaa0   : > { %v2229_v34 = vmax.f32 %v2227_v32, %v2228_v33 }
 0xaa2   : > { %2647 = vmatmul.msk.f32.vlgmr.msra.gmra.mxu2 %vm1948_vm9, %v2229_v34 }
 0xb25   : > { %v2253_v37 = vpop.f32.mrf.mxu2 }
 0xb26   : > { %v2254_v39 = vadd.f32 %v2253_v37, %v2232_v36 }
 0xb28   : > { %v2256_v38 = vperm.slane %v2254_v39, 0 }
 0xb2a   : > { %2257 = vst [vmem:[%s690_s0] sm:$0xff] %v2256_v38 }
 0xb2b PF: > { %p23_p9 = scmp.ge.s32.totalorder %s2944_s25, 4   ;;  %s3814_s21 = smov %s2816_s22 }
 0xb2c   : > { %s3815_s22 = smov %s2953_s28  ;;  %s3816_s23 = smov %s2944_s25 }
 0xb2d   :  { %25 = sbr.rel (!%p23_p9) target bundleno = 5 (0x5), region = 142 }

</bundles_post_ra>
